<compile_context>
chip_gen: v7x
topology: tpu7x:2x2x1
jax: 0.10.0
libtpu: 0.0.40
codegen_flags: <defaults>
</compile_context>

<pallas_src>
import functools
import math

import jax
import jax.numpy as jnp
from jax.experimental import pallas as pl
from jax.experimental.pallas import tpu as pltpu

EPS = 1e-12  # the reference module passes eps=1e-12 to both the LayerNorms and gLN


# ----------------------------------------------------------------------------
# Kernel helpers
# ----------------------------------------------------------------------------
def _layernorm(x, gamma, beta, eps):
    # per-token LayerNorm over the feature dim, biased variance (PyTorch LayerNorm),
    # rsqrt keeps the divide on the EUP slot.
    mean = jnp.mean(x, axis=-1, keepdims=True)
    var = jnp.mean((x - mean) ** 2, axis=-1, keepdims=True)
    return (x - mean) * jax.lax.rsqrt(var + eps) * gamma + beta


# ----------------------------------------------------------------------------
# Fused kernel: prologue + num_layers encoder layers + gLN + outer residual
# ----------------------------------------------------------------------------
def fused_intra_transformer_kernel(
        x_ref, pe_ref,
        wqkv_ref, bqkv_ref, wo_ref, bo_ref,
        w1_ref, b1_ref, w2_ref, b2_ref,
        g1_ref, be1_ref, g2_ref, be2_ref,
        gln_g_ref, gln_b_ref,
        o_ref, *, num_heads, eps, weights_resident):
    l = pl.program_id(1)
    num_layers = pl.num_programs(1)

    def W(ref):
        # resident: whole (L, ...) stack lives in VMEM, select layer l dynamically;
        # streamed: the BlockSpec already delivered layer l as a (1, ...) block.
        return ref[l] if weights_resident else ref[0]

    # --- prologue (layer 0 only): x = x + (x + pe) == 2*x + pe ---------------
    @pl.when(l == 0)
    def _():
        o_ref[...] = 2.0 * x_ref[...] + pe_ref[...]

    # --- one post-norm nn.TransformerEncoderLayer on the resident activation -
    h = o_ref[...]                  # (bn, T, F) float32, carried across layers
    bn, t, f = h.shape
    H = num_heads
    dh = f // H

    wqkv = W(wqkv_ref); bqkv = W(bqkv_ref)
    wo = W(wo_ref);     bo = W(bo_ref)
    w1 = W(w1_ref);     b1 = W(b1_ref)
    w2 = W(w2_ref);     b2 = W(b2_ref)
    g1 = W(g1_ref);     be1 = W(be1_ref)
    g2 = W(g2_ref);     be2 = W(be2_ref)
    cdt = wqkv.dtype                # MXU compute dtype (bf16 by default, f32 ok)

    h2d = h.reshape(bn * t, f)
    hb = h2d.astype(cdt)            # single cast of the activations

    # in-projection: ONE K=F matmul for all of Q, K, V (full MXU K utilisation).
    # The 1/sqrt(dh) query scale is folded into W_q / b_q at parameter-build time.
    qkv = jnp.dot(hb, wqkv, preferred_element_type=jnp.float32) + bqkv   # (bn*t, 3F) f32
    qkvb = qkv.astype(cdt)          # single cast of the whole qkv slab

    # Fold heads into a leading batch axis g = head*bn + n (one relayout per Q/K/V
    # instead of 3H per-head slices/scales/casts inside the attention math).
    def split_heads(base):
        cols = [qkvb[:, base + hh * dh: base + (hh + 1) * dh] for hh in range(H)]
        return jnp.concatenate(cols, axis=0).reshape(H * bn, t, dh)

    qg = split_heads(0)
    kg = split_heads(f)
    vg = split_heads(2 * f)

    # head-batched scaled-dot-product attention: ONE score einsum + softmax + ONE
    # PV einsum for all heads; statistics stay in f32.
    s = jnp.einsum('gtd,gsd->gts', qg, kg, preferred_element_type=jnp.float32)
    s = s - jnp.max(s, axis=-1, keepdims=True)
    p = jnp.exp(s)
    p = p * pl.reciprocal(jnp.sum(p, axis=-1, keepdims=True), approx=True)
    ctx = jnp.einsum('gts,gsd->gtd', p.astype(cdt), vg,
                     preferred_element_type=jnp.float32)                 # (H*bn, t, dh)

    # Re-assemble all heads onto the lane axis -> (bn*t, F), then ONE K=F output
    # projection (replaces H accumulated K=dh dots + H-1 full-width f32 adds).
    ctx_h = ctx.reshape(H, bn * t, dh)
    attn_in = jnp.concatenate([ctx_h[hh] for hh in range(H)], axis=-1)   # (bn*t, F)
    attn = jnp.dot(attn_in.astype(cdt), wo, preferred_element_type=jnp.float32) + bo

    # post-norm residual block 1 (dropout = identity in eval)
    y = _layernorm(h2d + attn, g1, be1, eps)

    # feed-forward (relu) + post-norm residual block 2
    h1 = jnp.maximum(jnp.dot(y.astype(cdt), w1,
                             preferred_element_type=jnp.float32) + b1, 0.0)
    ffn = jnp.dot(h1.astype(cdt), w2, preferred_element_type=jnp.float32) + b2
    z = _layernorm(y + ffn, g2, be2, eps).reshape(bn, t, f)

    # --- carry to the next layer, or finalize (gLN + outer residual) ---------
    @pl.when(l < num_layers - 1)
    def _():
        o_ref[...] = z

    @pl.when(l == num_layers - 1)
    def _():
        # gLN = GroupNorm(1, F) per sequence over all (T, F) elements, biased
        # variance.  Two-pass (mean, then centered variance) on the resident tile
        # for numerical robustness at large T*F.
        inv_cnt = 1.0 / float(t * f)
        mean = jnp.sum(jnp.sum(z, axis=2, keepdims=True),
                       axis=1, keepdims=True) * inv_cnt
        zc = z - mean
        var = jnp.sum(jnp.sum(zc * zc, axis=2, keepdims=True),
                      axis=1, keepdims=True) * inv_cnt
        zn = zc * jax.lax.rsqrt(var + eps) * gln_g_ref[...] + gln_b_ref[...]
        o_ref[...] = zn + x_ref[...]          # outer residual of IntraTransformer


# ----------------------------------------------------------------------------
# JAX glue
# ----------------------------------------------------------------------------
def positional_encoding(t, f, base=10000.0):
    pos = jnp.arange(t, dtype=jnp.float32)[:, None]
    idx = jnp.arange(0, f, 2, dtype=jnp.float32) / f
    ang = pos / (base ** idx[None, :])
    # interleaved [sin0, cos0, sin1, cos1, ...] like the reference stack+view
    return jnp.stack([jnp.sin(ang), jnp.cos(ang)], axis=-1).reshape(t, f)


def _vmem_capacity_bytes():
    """Generation-aware VMEM capacity (per TensorCore)."""
    try:
        return int(pltpu.get_tpu_info().vmem_capacity_bytes)
    except Exception:
        pass
    try:
        kind = jax.devices()[0].device_kind.lower()
        if ('v5' in kind) or ('v6' in kind):
            return 128 * 1024 * 1024
    except Exception:
        pass
    return 64 * 1024 * 1024   # conservative (v7x-sized) default


def _choose_block_n(n, t, f, d_ff, num_heads, tile_budget_bytes, min_grid):
    """Largest divisor of N whose estimated live f32 footprint (double-buffered
    in/out activation tiles + qkv / scores / FFN intermediates) fits the tile
    budget, while keeping at least `min_grid` N tiles (>=2 keeps both v7x
    TensorCores busy under dimension_semantics=('parallel', ...))."""
    per_seq = 4 * t * (18 * f + 3 * d_ff) + 8 * num_heads * t * t
    best = 1
    for cand in range(1, n + 1):
        if n % cand:
            continue
        if (n // cand) < min_grid:
            continue
        if cand * per_seq <= tile_budget_bytes:
            best = cand
    return best


@functools.partial(jax.jit, static_argnames=('num_heads', 'eps'))
def intra_transformer_forward(x, params, *, num_heads, eps=EPS):
    """x: (B, F, S, C) -> (B, F, S, C), matching IntraTransformer.forward (eval)."""
    b, f, s, c = x.shape
    n, t = b * s, c
    num_layers = params['wqkv'].shape[0]
    d_ff = params['w1'].shape[-1]
    assert f % num_heads == 0

    # (B, F, S, C) -> (N, T, F) with n = b*S + s, t = chunk index
    x_ntf = jnp.transpose(x, (0, 2, 3, 1)).reshape(n, t, f)
    pe = positional_encoding(t, f)

    weight_keys = ('wqkv', 'bqkv', 'wo', 'bo', 'w1', 'b1', 'w2', 'b2',
                   'g1', 'be1', 'g2', 'be2')
    stack_bytes = sum(params[k].size * params[k].dtype.itemsize for k in weight_keys)
    per_layer_bytes = stack_bytes // num_layers

    vmem_cap = _vmem_capacity_bytes()
    vmem_limit = int(vmem_cap * 0.75)          # ~96 MiB on v5e/v6e, ~48 MiB on v7x

    # Keep the whole layer stack resident in VMEM (constant index_map -> fetched
    # once, never re-streamed per N tile) whenever it comfortably fits, accounting
    # for the pipeline's double buffering; otherwise stream one layer at a time.
    weights_resident = (2 * stack_bytes) <= (vmem_limit // 3)
    weight_vmem = 2 * (stack_bytes if weights_resident else per_layer_bytes)
    tile_budget = max(vmem_limit - weight_vmem - 6 * 1024 * 1024, 2 * 1024 * 1024)

    min_grid = 2 if n >= 2 else 1
    block_n = _choose_block_n(n, t, f, d_ff, num_heads, tile_budget, min_grid)
    grid = (n // block_n, num_layers)

    act_spec = pl.BlockSpec((block_n, t, f), lambda i, l: (i, 0, 0))   # resident over l
    pe_spec = pl.BlockSpec((t, f), lambda i, l: (0, 0))
    gln_spec = pl.BlockSpec((1, f), lambda i, l: (0, 0))

    if weights_resident:
        def wspec(arr):   # full (L, ...) stack, constant block index -> loaded once
            return pl.BlockSpec(arr.shape, lambda i, l: (0, 0, 0))
    else:
        def wspec(arr):   # stream one layer per grid step along the l axis
            return pl.BlockSpec((1,) + arr.shape[1:], lambda i, l: (l, 0, 0))

    kernel = functools.partial(fused_intra_transformer_kernel,
                               num_heads=num_heads, eps=eps,
                               weights_resident=weights_resident)

    out_ntf = pl.pallas_call(
        kernel,
        out_shape=jax.ShapeDtypeStruct((n, t, f), jnp.float32),
        grid=grid,
        in_specs=[
            act_spec, pe_spec,
            wspec(params['wqkv']), wspec(params['bqkv']),
            wspec(params['wo']), wspec(params['bo']),
            wspec(params['w1']), wspec(params['b1']),
            wspec(params['w2']), wspec(params['b2']),
            wspec(params['g1']), wspec(params['be1']),
            wspec(params['g2']), wspec(params['be2']),
            gln_spec, gln_spec,
        ],
        out_specs=act_spec,
        compiler_params=pltpu.CompilerParams(
            dimension_semantics=("parallel", "arbitrary"),
            vmem_limit_bytes=vmem_limit),
    )(x_ntf, pe,
      params['wqkv'], params['bqkv'], params['wo'], params['bo'],
      params['w1'], params['b1'], params['w2'], params['b2'],
      params['g1'], params['be1'], params['g2'], params['be2'],
      params['gln_gamma'], params['gln_beta'])

    # (N, T, F) -> (B, F, S, C)
    return out_ntf.reshape(b, s, c, f).transpose(0, 3, 1, 2)


def init_params(key, f, d_ff, num_layers, num_heads, matmul_dtype=jnp.bfloat16):
    """Deterministic synthetic parameters, stacked over layers (leading L dim).
    Linear weights are stored pre-transposed (in_dim, out_dim) == torch_weight.T and
    cast to `matmul_dtype` (bf16 feeds the MXU at full rate and halves VMEM/DMA bytes);
    biases, LayerNorm and gLN parameters stay float32 (f32 statistics in-kernel).
    The 1/sqrt(dh) attention scale is folded into W_q / b_q (Q output columns)."""
    ks = jax.random.split(key, 8)
    L = num_layers
    dh = f // num_heads
    scale = 1.0 / math.sqrt(dh)
    col_scale = jnp.concatenate([jnp.full((f,), scale, jnp.float32),
                                 jnp.ones((2 * f,), jnp.float32)])

    def w(k, shape):
        return 0.05 * jax.random.normal(k, shape, jnp.float32)

    return dict(
        wqkv=(w(ks[0], (L, f, 3 * f)) * col_scale).astype(matmul_dtype),
        bqkv=w(ks[1], (L, 1, 3 * f)) * col_scale,
        wo=w(ks[2], (L, f, f)).astype(matmul_dtype),
        bo=w(ks[3], (L, 1, f)),
        w1=w(ks[4], (L, f, d_ff)).astype(matmul_dtype),
        b1=w(ks[5], (L, 1, d_ff)),
        w2=w(ks[6], (L, d_ff, f)).astype(matmul_dtype),
        b2=w(ks[7], (L, 1, f)),
        g1=jnp.ones((L, 1, f), jnp.float32),
        be1=jnp.zeros((L, 1, f), jnp.float32),
        g2=jnp.ones((L, 1, f), jnp.float32),
        be2=jnp.zeros((L, 1, f), jnp.float32),
        gln_gamma=jnp.ones((1, f), jnp.float32),
        gln_beta=jnp.zeros((1, f), jnp.float32),
    )


if __name__ == "__main__":
    # small shapes consistent with IntraTransformer's (batch, num_features, S, chunk)
    B, F, S, C = 2, 32, 4, 8
    num_heads, d_ff, num_layers = 4, 64, 2

    key = jax.random.PRNGKey(0)
    kx, kp = jax.random.split(key)
    x = jax.random.normal(kx, (B, F, S, C), dtype=jnp.float32)
    params = init_params(kp, F, d_ff, num_layers, num_heads)

    out = intra_transformer_forward(x, params, num_heads=num_heads)
    out = jax.block_until_ready(out)

    assert out.shape == (B, F, S, C)
    assert bool(jnp.all(jnp.isfinite(out)))
    # TODO(synk): dropout (p=0.1) inside the encoder layers is modeled as identity (eval mode).
    print("KERNEL_OK")
</pallas_src>

<mosaic_0001>
module attributes {stable_mosaic.version = 11 : i64} {
  func.func @fused_intra_transformer_kernel(%arg0: i32, %arg1: i32, %arg2: memref<4x8x32xf32, #tpu.memory_space<vmem>>, %arg3: memref<8x32xf32, #tpu.memory_space<vmem>>, %arg4: memref<2x32x96xbf16, #tpu.memory_space<vmem>>, %arg5: memref<2x1x96xf32, #tpu.memory_space<vmem>>, %arg6: memref<2x32x32xbf16, #tpu.memory_space<vmem>>, %arg7: memref<2x1x32xf32, #tpu.memory_space<vmem>>, %arg8: memref<2x32x64xbf16, #tpu.memory_space<vmem>>, %arg9: memref<2x1x64xf32, #tpu.memory_space<vmem>>, %arg10: memref<2x64x32xbf16, #tpu.memory_space<vmem>>, %arg11: memref<2x1x32xf32, #tpu.memory_space<vmem>>, %arg12: memref<2x1x32xf32, #tpu.memory_space<vmem>>, %arg13: memref<2x1x32xf32, #tpu.memory_space<vmem>>, %arg14: memref<2x1x32xf32, #tpu.memory_space<vmem>>, %arg15: memref<2x1x32xf32, #tpu.memory_space<vmem>>, %arg16: memref<1x32xf32, #tpu.memory_space<vmem>>, %arg17: memref<1x32xf32, #tpu.memory_space<vmem>>, %arg18: memref<4x8x32xf32, #tpu.memory_space<vmem>>) attributes {dimension_semantics = [#tpu.dimension_semantics<parallel>, #tpu.dimension_semantics<arbitrary>], iteration_bounds = array<i64: 2, 2>, scalar_prefetch = 0 : i64, scratch_operands = 0 : i64, tpu.core_type = #tpu.core_type<tc>, window_params = [{transform_indices = @transform_0, window_bounds = array<i64: 4, 8, 32>}, {pipeline_mode = #tpu.pipeline_mode<synchronous>, transform_indices = @transform_1, window_bounds = array<i64: 8, 32>}, {pipeline_mode = #tpu.pipeline_mode<synchronous>, transform_indices = @transform_2, window_bounds = array<i64: 2, 32, 96>}, {pipeline_mode = #tpu.pipeline_mode<synchronous>, transform_indices = @transform_3, window_bounds = array<i64: 2, 1, 96>}, {pipeline_mode = #tpu.pipeline_mode<synchronous>, transform_indices = @transform_4, window_bounds = array<i64: 2, 32, 32>}, {pipeline_mode = #tpu.pipeline_mode<synchronous>, transform_indices = @transform_5, window_bounds = array<i64: 2, 1, 32>}, {pipeline_mode = #tpu.pipeline_mode<synchronous>, transform_indices = @transform_6, window_bounds = array<i64: 2, 32, 64>}, {pipeline_mode = #tpu.pipeline_mode<synchronous>, transform_indices = @transform_7, window_bounds = array<i64: 2, 1, 64>}, {pipeline_mode = #tpu.pipeline_mode<synchronous>, transform_indices = @transform_8, window_bounds = array<i64: 2, 64, 32>}, {pipeline_mode = #tpu.pipeline_mode<synchronous>, transform_indices = @transform_9, window_bounds = array<i64: 2, 1, 32>}, {pipeline_mode = #tpu.pipeline_mode<synchronous>, transform_indices = @transform_10, window_bounds = array<i64: 2, 1, 32>}, {pipeline_mode = #tpu.pipeline_mode<synchronous>, transform_indices = @transform_11, window_bounds = array<i64: 2, 1, 32>}, {pipeline_mode = #tpu.pipeline_mode<synchronous>, transform_indices = @transform_12, window_bounds = array<i64: 2, 1, 32>}, {pipeline_mode = #tpu.pipeline_mode<synchronous>, transform_indices = @transform_13, window_bounds = array<i64: 2, 1, 32>}, {pipeline_mode = #tpu.pipeline_mode<synchronous>, transform_indices = @transform_14, window_bounds = array<i64: 1, 32>}, {pipeline_mode = #tpu.pipeline_mode<synchronous>, transform_indices = @transform_15, window_bounds = array<i64: 1, 32>}, {transform_indices = @transform_16, window_bounds = array<i64: 4, 8, 32>}]} {
    %c0_i32 = arith.constant 0 : i32
    %0 = arith.cmpi eq, %arg1, %c0_i32 : i32
    %1 = arith.extui %0 : i1 to i32
    %c0_i32_0 = arith.constant 0 : i32
    %2 = arith.cmpi ne, %1, %c0_i32_0 : i32
    scf.if %2 {
      %c0_48 = arith.constant 0 : index
      %c0_49 = arith.constant 0 : index
      %c0_50 = arith.constant 0 : index
      %154 = vector.load %arg2[%c0_48, %c0_49, %c0_50] : memref<4x8x32xf32, #tpu.memory_space<vmem>>, vector<4x8x32xf32>
      %cst_51 = arith.constant 2.000000e+00 : f32
      %155 = vector.broadcast %cst_51 : f32 to vector<4x8x32xf32>
      %156 = arith.mulf %155, %154 : vector<4x8x32xf32>
      %c0_52 = arith.constant 0 : index
      %c0_53 = arith.constant 0 : index
      %157 = vector.load %arg3[%c0_52, %c0_53] : memref<8x32xf32, #tpu.memory_space<vmem>>, vector<8x32xf32>
      %158 = vector.shape_cast %157 : vector<8x32xf32> to vector<1x8x32xf32>
      %159 = vector.broadcast %158 : vector<1x8x32xf32> to vector<4x8x32xf32>
      %160 = arith.addf %156, %159 : vector<4x8x32xf32>
      %c0_54 = arith.constant 0 : index
      %c0_55 = arith.constant 0 : index
      %c0_56 = arith.constant 0 : index
      %161 = vector.load %arg18[%c0_54, %c0_55, %c0_56] : memref<4x8x32xf32, #tpu.memory_space<vmem>>, vector<4x8x32xf32>
      tpu.vector_store %arg18[%c0_54, %c0_55, %c0_56], %160 {strides = array<i32>} : memref<4x8x32xf32, #tpu.memory_space<vmem>>, vector<4x8x32xf32>,
    } else {
    }
    %c0 = arith.constant 0 : index
    %c0_1 = arith.constant 0 : index
    %c0_2 = arith.constant 0 : index
    %3 = vector.load %arg18[%c0, %c0_1, %c0_2] : memref<4x8x32xf32, #tpu.memory_space<vmem>>, vector<4x8x32xf32>
    %4 = arith.index_cast %arg1 : i32 to index
    %c0_3 = arith.constant 0 : index
    %c0_4 = arith.constant 0 : index
    %5 = vector.load %arg4[%4, %c0_3, %c0_4] : memref<2x32x96xbf16, #tpu.memory_space<vmem>>, vector<1x32x96xbf16>
    %6 = vector.shape_cast %5 : vector<1x32x96xbf16> to vector<32x96xbf16>
    %7 = arith.index_cast %arg1 : i32 to index
    %c0_5 = arith.constant 0 : index
    %c0_6 = arith.constant 0 : index
    %8 = vector.load %arg5[%7, %c0_5, %c0_6] : memref<2x1x96xf32, #tpu.memory_space<vmem>>, vector<1x1x96xf32>
    %9 = vector.shape_cast %8 : vector<1x1x96xf32> to vector<1x96xf32>
    %10 = arith.index_cast %arg1 : i32 to index
    %c0_7 = arith.constant 0 : index
    %c0_8 = arith.constant 0 : index
    %11 = vector.load %arg6[%10, %c0_7, %c0_8] : memref<2x32x32xbf16, #tpu.memory_space<vmem>>, vector<1x32x32xbf16>
    %12 = vector.shape_cast %11 : vector<1x32x32xbf16> to vector<32x32xbf16>
    %13 = arith.index_cast %arg1 : i32 to index
    %c0_9 = arith.constant 0 : index
    %c0_10 = arith.constant 0 : index
    %14 = vector.load %arg7[%13, %c0_9, %c0_10] : memref<2x1x32xf32, #tpu.memory_space<vmem>>, vector<1x1x32xf32>
    %15 = vector.shape_cast %14 : vector<1x1x32xf32> to vector<1x32xf32>
    %16 = arith.index_cast %arg1 : i32 to index
    %c0_11 = arith.constant 0 : index
    %c0_12 = arith.constant 0 : index
    %17 = vector.load %arg8[%16, %c0_11, %c0_12] : memref<2x32x64xbf16, #tpu.memory_space<vmem>>, vector<1x32x64xbf16>
    %18 = vector.shape_cast %17 : vector<1x32x64xbf16> to vector<32x64xbf16>
    %19 = arith.index_cast %arg1 : i32 to index
    %c0_13 = arith.constant 0 : index
    %c0_14 = arith.constant 0 : index
    %20 = vector.load %arg9[%19, %c0_13, %c0_14] : memref<2x1x64xf32, #tpu.memory_space<vmem>>, vector<1x1x64xf32>
    %21 = vector.shape_cast %20 : vector<1x1x64xf32> to vector<1x64xf32>
    %22 = arith.index_cast %arg1 : i32 to index
    %c0_15 = arith.constant 0 : index
    %c0_16 = arith.constant 0 : index
    %23 = vector.load %arg10[%22, %c0_15, %c0_16] : memref<2x64x32xbf16, #tpu.memory_space<vmem>>, vector<1x64x32xbf16>
    %24 = vector.shape_cast %23 : vector<1x64x32xbf16> to vector<64x32xbf16>
    %25 = arith.index_cast %arg1 : i32 to index
    %c0_17 = arith.constant 0 : index
    %c0_18 = arith.constant 0 : index
    %26 = vector.load %arg11[%25, %c0_17, %c0_18] : memref<2x1x32xf32, #tpu.memory_space<vmem>>, vector<1x1x32xf32>
    %27 = vector.shape_cast %26 : vector<1x1x32xf32> to vector<1x32xf32>
    %28 = arith.index_cast %arg1 : i32 to index
    %c0_19 = arith.constant 0 : index
    %c0_20 = arith.constant 0 : index
    %29 = vector.load %arg12[%28, %c0_19, %c0_20] : memref<2x1x32xf32, #tpu.memory_space<vmem>>, vector<1x1x32xf32>
    %30 = vector.shape_cast %29 : vector<1x1x32xf32> to vector<1x32xf32>
    %31 = arith.index_cast %arg1 : i32 to index
    %c0_21 = arith.constant 0 : index
    %c0_22 = arith.constant 0 : index
    %32 = vector.load %arg13[%31, %c0_21, %c0_22] : memref<2x1x32xf32, #tpu.memory_space<vmem>>, vector<1x1x32xf32>
    %33 = vector.shape_cast %32 : vector<1x1x32xf32> to vector<1x32xf32>
    %34 = arith.index_cast %arg1 : i32 to index
    %c0_23 = arith.constant 0 : index
    %c0_24 = arith.constant 0 : index
    %35 = vector.load %arg14[%34, %c0_23, %c0_24] : memref<2x1x32xf32, #tpu.memory_space<vmem>>, vector<1x1x32xf32>
    %36 = vector.shape_cast %35 : vector<1x1x32xf32> to vector<1x32xf32>
    %37 = arith.index_cast %arg1 : i32 to index
    %c0_25 = arith.constant 0 : index
    %c0_26 = arith.constant 0 : index
    %38 = vector.load %arg15[%37, %c0_25, %c0_26] : memref<2x1x32xf32, #tpu.memory_space<vmem>>, vector<1x1x32xf32>
    %39 = vector.shape_cast %38 : vector<1x1x32xf32> to vector<1x32xf32>
    %40 = vector.shape_cast %3 : vector<4x8x32xf32> to vector<32x32xf32>
    %41 = arith.truncf %40 : vector<32x32xf32> to vector<32x32xbf16>
    %cst = arith.constant dense<0.000000e+00> : vector<32x96xf32>
    %42 = tpu.matmul %41, %6, %cst {dimension_numbers = #tpu.dot_dimension_numbers<[1], [0], [0], [1], [0, 0, 1, 1], [], []>} : vector<32x32xbf16>, vector<32x96xbf16>, vector<32x96xf32> -> vector<32x96xf32>
    %43 = vector.broadcast %9 : vector<1x96xf32> to vector<32x96xf32>
    %44 = arith.addf %42, %43 : vector<32x96xf32>
    %45 = arith.truncf %44 : vector<32x96xf32> to vector<32x96xbf16>
    %46 = vector.extract_strided_slice %45 {offsets = [0, 0], sizes = [32, 8], strides = [1, 1]} : vector<32x96xbf16> to vector<32x8xbf16>
    %47 = vector.extract_strided_slice %45 {offsets = [0, 8], sizes = [32, 8], strides = [1, 1]} : vector<32x96xbf16> to vector<32x8xbf16>
    %48 = vector.extract_strided_slice %45 {offsets = [0, 16], sizes = [32, 8], strides = [1, 1]} : vector<32x96xbf16> to vector<32x8xbf16>
    %49 = vector.extract_strided_slice %45 {offsets = [0, 24], sizes = [32, 8], strides = [1, 1]} : vector<32x96xbf16> to vector<32x8xbf16>
    %50 = tpu.concatenate %46, %47, %48, %49 in 0 : vector<32x8xbf16>, vector<32x8xbf16>, vector<32x8xbf16>, vector<32x8xbf16> -> vector<128x8xbf16>
    %51 = vector.shape_cast %50 : vector<128x8xbf16> to vector<16x8x8xbf16>
    %52 = vector.extract_strided_slice %45 {offsets = [0, 32], sizes = [32, 8], strides = [1, 1]} : vector<32x96xbf16> to vector<32x8xbf16>
    %53 = vector.extract_strided_slice %45 {offsets = [0, 40], sizes = [32, 8], strides = [1, 1]} : vector<32x96xbf16> to vector<32x8xbf16>
    %54 = vector.extract_strided_slice %45 {offsets = [0, 48], sizes = [32, 8], strides = [1, 1]} : vector<32x96xbf16> to vector<32x8xbf16>
    %55 = vector.extract_strided_slice %45 {offsets = [0, 56], sizes = [32, 8], strides = [1, 1]} : vector<32x96xbf16> to vector<32x8xbf16>
    %56 = tpu.concatenate %52, %53, %54, %55 in 0 : vector<32x8xbf16>, vector<32x8xbf16>, vector<32x8xbf16>, vector<32x8xbf16> -> vector<128x8xbf16>
    %57 = vector.shape_cast %56 : vector<128x8xbf16> to vector<16x8x8xbf16>
    %58 = vector.extract_strided_slice %45 {offsets = [0, 64], sizes = [32, 8], strides = [1, 1]} : vector<32x96xbf16> to vector<32x8xbf16>
    %59 = vector.extract_strided_slice %45 {offsets = [0, 72], sizes = [32, 8], strides = [1, 1]} : vector<32x96xbf16> to vector<32x8xbf16>
    %60 = vector.extract_strided_slice %45 {offsets = [0, 80], sizes = [32, 8], strides = [1, 1]} : vector<32x96xbf16> to vector<32x8xbf16>
    %61 = vector.extract_strided_slice %45 {offsets = [0, 88], sizes = [32, 8], strides = [1, 1]} : vector<32x96xbf16> to vector<32x8xbf16>
    %62 = tpu.concatenate %58, %59, %60, %61 in 0 : vector<32x8xbf16>, vector<32x8xbf16>, vector<32x8xbf16>, vector<32x8xbf16> -> vector<128x8xbf16>
    %63 = vector.shape_cast %62 : vector<128x8xbf16> to vector<16x8x8xbf16>
    "tpu.trace_start"() <{level = 10 : i32, message = "gtd,gsd->gts"}> : () -> ()
    %cst_27 = arith.constant dense<0.000000e+00> : vector<16x8x8xf32>
    %64 = tpu.matmul %51, %57, %cst_27 {dimension_numbers = #tpu.dot_dimension_numbers<[2], [2], [1], [1], [0, 0, 0, 1, 1, 1], [0], [0]>} : vector<16x8x8xbf16>, vector<16x8x8xbf16>, vector<16x8x8xf32> -> vector<16x8x8xf32>
    "tpu.trace_stop"() : () -> ()
    %cst_28 = arith.constant dense<0xFF800000> : vector<16x8xf32>
    %65 = vector.multi_reduction <maximumf>, %64, %cst_28 [2] : vector<16x8x8xf32> to vector<16x8xf32>
    %66 = vector.shape_cast %65 : vector<16x8xf32> to vector<16x8x1xf32>
    %67 = vector.broadcast %66 : vector<16x8x1xf32> to vector<16x8x8xf32>
    %68 = arith.subf %64, %67 : vector<16x8x8xf32>
    %69 = math.exp %68 : vector<16x8x8xf32>
    %cst_29 = arith.constant dense<0.000000e+00> : vector<16x8xf32>
    %70 = vector.multi_reduction <add>, %69, %cst_29 [2] : vector<16x8x8xf32> to vector<16x8xf32>
    %71 = vector.shape_cast %70 : vector<16x8xf32> to vector<16x8x1xf32>
    %72 = tpu.reciprocal %71 {approx = true} : vector<16x8x1xf32> -> vector<16x8x1xf32>
    %73 = vector.broadcast %72 : vector<16x8x1xf32> to vector<16x8x8xf32>
    %74 = arith.mulf %69, %73 : vector<16x8x8xf32>
    %75 = arith.truncf %74 : vector<16x8x8xf32> to vector<16x8x8xbf16>
    "tpu.trace_start"() <{level = 10 : i32, message = "gts,gsd->gtd"}> : () -> ()
    %cst_30 = arith.constant dense<0.000000e+00> : vector<16x8x8xf32>
    %76 = tpu.matmul %75, %63, %cst_30 {dimension_numbers = #tpu.dot_dimension_numbers<[2], [1], [1], [2], [0, 0, 0, 1, 1, 2], [0], [0]>} : vector<16x8x8xbf16>, vector<16x8x8xbf16>, vector<16x8x8xf32> -> vector<16x8x8xf32>
    "tpu.trace_stop"() : () -> ()
    %77 = vector.shape_cast %76 : vector<16x8x8xf32> to vector<4x32x8xf32>
    %78 = vector.extract_strided_slice %77 {offsets = [0, 0, 0], sizes = [1, 32, 8], strides = [1, 1, 1]} : vector<4x32x8xf32> to vector<1x32x8xf32>
    %79 = vector.shape_cast %78 : vector<1x32x8xf32> to vector<32x8xf32>
    %80 = vector.extract_strided_slice %77 {offsets = [1, 0, 0], sizes = [1, 32, 8], strides = [1, 1, 1]} : vector<4x32x8xf32> to vector<1x32x8xf32>
    %81 = vector.shape_cast %80 : vector<1x32x8xf32> to vector<32x8xf32>
    %82 = vector.extract_strided_slice %77 {offsets = [2, 0, 0], sizes = [1, 32, 8], strides = [1, 1, 1]} : vector<4x32x8xf32> to vector<1x32x8xf32>
    %83 = vector.shape_cast %82 : vector<1x32x8xf32> to vector<32x8xf32>
    %84 = vector.extract_strided_slice %77 {offsets = [3, 0, 0], sizes = [1, 32, 8], strides = [1, 1, 1]} : vector<4x32x8xf32> to vector<1x32x8xf32>
    %85 = vector.shape_cast %84 : vector<1x32x8xf32> to vector<32x8xf32>
    %86 = tpu.concatenate %79, %81, %83, %85 in 1 : vector<32x8xf32>, vector<32x8xf32>, vector<32x8xf32>, vector<32x8xf32> -> vector<32x32xf32>
    %87 = arith.truncf %86 : vector<32x32xf32> to vector<32x32xbf16>
    %cst_31 = arith.constant dense<0.000000e+00> : vector<32x32xf32>
    %88 = tpu.matmul %87, %12, %cst_31 {dimension_numbers = #tpu.dot_dimension_numbers<[1], [0], [0], [1], [0, 0, 1, 1], [], []>} : vector<32x32xbf16>, vector<32x32xbf16>, vector<32x32xf32> -> vector<32x32xf32>
    %89 = vector.broadcast %15 : vector<1x32xf32> to vector<32x32xf32>
    %90 = arith.addf %88, %89 : vector<32x32xf32>
    %91 = arith.addf %40, %90 : vector<32x32xf32>
    %cst_32 = arith.constant dense<0.000000e+00> : vector<32xf32>
    %92 = vector.multi_reduction <add>, %91, %cst_32 [1] : vector<32x32xf32> to vector<32xf32>
    %93 = vector.shape_cast %92 : vector<32xf32> to vector<32x1xf32>
    %cst_33 = arith.constant 3.200000e+01 : f32
    %94 = vector.broadcast %cst_33 : f32 to vector<32x1xf32>
    %95 = arith.divf %93, %94 : vector<32x1xf32>
    %96 = vector.broadcast %95 : vector<32x1xf32> to vector<32x32xf32>
    %97 = arith.subf %91, %96 : vector<32x32xf32>
    %98 = arith.mulf %97, %97 : vector<32x32xf32>
    %cst_34 = arith.constant dense<0.000000e+00> : vector<32xf32>
    %99 = vector.multi_reduction <add>, %98, %cst_34 [1] : vector<32x32xf32> to vector<32xf32>
    %100 = vector.shape_cast %99 : vector<32xf32> to vector<32x1xf32>
    %cst_35 = arith.constant 3.200000e+01 : f32
    %101 = vector.broadcast %cst_35 : f32 to vector<32x1xf32>
    %102 = arith.divf %100, %101 : vector<32x1xf32>
    %103 = vector.broadcast %95 : vector<32x1xf32> to vector<32x32xf32>
    %104 = arith.subf %91, %103 : vector<32x32xf32>
    %cst_36 = arith.constant 9.99999996E-13 : f32
    %105 = vector.broadcast %cst_36 : f32 to vector<32x1xf32>
    %106 = arith.addf %102, %105 : vector<32x1xf32>
    %107 = math.rsqrt %106 : vector<32x1xf32>
    %108 = vector.broadcast %107 : vector<32x1xf32> to vector<32x32xf32>
    %109 = arith.mulf %104, %108 : vector<32x32xf32>
    %110 = vector.broadcast %30 : vector<1x32xf32> to vector<32x32xf32>
    %111 = arith.mulf %109, %110 : vector<32x32xf32>
    %112 = vector.broadcast %33 : vector<1x32xf32> to vector<32x32xf32>
    %113 = arith.addf %111, %112 : vector<32x32xf32>
    %114 = arith.truncf %113 : vector<32x32xf32> to vector<32x32xbf16>
    %cst_37 = arith.constant dense<0.000000e+00> : vector<32x64xf32>
    %115 = tpu.matmul %114, %18, %cst_37 {dimension_numbers = #tpu.dot_dimension_numbers<[1], [0], [0], [1], [0, 0, 1, 1], [], []>} : vector<32x32xbf16>, vector<32x64xbf16>, vector<32x64xf32> -> vector<32x64xf32>
    %116 = vector.broadcast %21 : vector<1x64xf32> to vector<32x64xf32>
    %117 = arith.addf %115, %116 : vector<32x64xf32>
    %cst_38 = arith.constant 0.000000e+00 : f32
    %118 = vector.broadcast %cst_38 : f32 to vector<32x64xf32>
    %119 = arith.maximumf %117, %118 : vector<32x64xf32>
    %120 = arith.truncf %119 : vector<32x64xf32> to vector<32x64xbf16>
    %cst_39 = arith.constant dense<0.000000e+00> : vector<32x32xf32>
    %121 = tpu.matmul %120, %24, %cst_39 {dimension_numbers = #tpu.dot_dimension_numbers<[1], [0], [0], [1], [0, 0, 1, 1], [], []>} : vector<32x64xbf16>, vector<64x32xbf16>, vector<32x32xf32> -> vector<32x32xf32>
    %122 = vector.broadcast %27 : vector<1x32xf32> to vector<32x32xf32>
    %123 = arith.addf %121, %122 : vector<32x32xf32>
    %124 = arith.addf %113, %123 : vector<32x32xf32>
    %cst_40 = arith.constant dense<0.000000e+00> : vector<32xf32>
    %125 = vector.multi_reduction <add>, %124, %cst_40 [1] : vector<32x32xf32> to vector<32xf32>
    %126 = vector.shape_cast %125 : vector<32xf32> to vector<32x1xf32>
    %cst_41 = arith.constant 3.200000e+01 : f32
    %127 = vector.broadcast %cst_41 : f32 to vector<32x1xf32>
    %128 = arith.divf %126, %127 : vector<32x1xf32>
    %129 = vector.broadcast %128 : vector<32x1xf32> to vector<32x32xf32>
    %130 = arith.subf %124, %129 : vector<32x32xf32>
    %131 = arith.mulf %130, %130 : vector<32x32xf32>
    %cst_42 = arith.constant dense<0.000000e+00> : vector<32xf32>
    %132 = vector.multi_reduction <add>, %131, %cst_42 [1] : vector<32x32xf32> to vector<32xf32>
    %133 = vector.shape_cast %132 : vector<32xf32> to vector<32x1xf32>
    %cst_43 = arith.constant 3.200000e+01 : f32
    %134 = vector.broadcast %cst_43 : f32 to vector<32x1xf32>
    %135 = arith.divf %133, %134 : vector<32x1xf32>
    %136 = vector.broadcast %128 : vector<32x1xf32> to vector<32x32xf32>
    %137 = arith.subf %124, %136 : vector<32x32xf32>
    %cst_44 = arith.constant 9.99999996E-13 : f32
    %138 = vector.broadcast %cst_44 : f32 to vector<32x1xf32>
    %139 = arith.addf %135, %138 : vector<32x1xf32>
    %140 = math.rsqrt %139 : vector<32x1xf32>
    %141 = vector.broadcast %140 : vector<32x1xf32> to vector<32x32xf32>
    %142 = arith.mulf %137, %141 : vector<32x32xf32>
    %143 = vector.broadcast %36 : vector<1x32xf32> to vector<32x32xf32>
    %144 = arith.mulf %142, %143 : vector<32x32xf32>
    %145 = vector.broadcast %39 : vector<1x32xf32> to vector<32x32xf32>
    %146 = arith.addf %144, %145 : vector<32x32xf32>
    %147 = vector.shape_cast %146 : vector<32x32xf32> to vector<4x8x32xf32>
    %c1_i32 = arith.constant 1 : i32
    %148 = arith.cmpi slt, %arg1, %c1_i32 : i32
    %149 = arith.extui %148 : i1 to i32
    %c0_i32_45 = arith.constant 0 : i32
    %150 = arith.cmpi ne, %149, %c0_i32_45 : i32
    scf.if %150 {
      %c0_48 = arith.constant 0 : index
      %c0_49 = arith.constant 0 : index
      %c0_50 = arith.constant 0 : index
      %154 = vector.load %arg18[%c0_48, %c0_49, %c0_50] : memref<4x8x32xf32, #tpu.memory_space<vmem>>, vector<4x8x32xf32>
      tpu.vector_store %arg18[%c0_48, %c0_49, %c0_50], %147 {strides = array<i32>} : memref<4x8x32xf32, #tpu.memory_space<vmem>>, vector<4x8x32xf32>,
    } else {
    }
    %c1_i32_46 = arith.constant 1 : i32
    %151 = arith.cmpi eq, %arg1, %c1_i32_46 : i32
    %152 = arith.extui %151 : i1 to i32
    %c0_i32_47 = arith.constant 0 : i32
    %153 = arith.cmpi ne, %152, %c0_i32_47 : i32
    scf.if %153 {
      %cst_48 = arith.constant dense<0.000000e+00> : vector<4x8xf32>
      %154 = vector.multi_reduction <add>, %147, %cst_48 [2] : vector<4x8x32xf32> to vector<4x8xf32>
      %155 = vector.shape_cast %154 : vector<4x8xf32> to vector<4x8x1xf32>
      %cst_49 = arith.constant dense<0.000000e+00> : vector<4x1xf32>
      %156 = vector.multi_reduction <add>, %155, %cst_49 [1] : vector<4x8x1xf32> to vector<4x1xf32>
      %157 = vector.shape_cast %156 : vector<4x1xf32> to vector<4x1x1xf32>
      %cst_50 = arith.constant 3.906250e-03 : f32
      %158 = vector.broadcast %cst_50 : f32 to vector<4x1x1xf32>
      %159 = arith.mulf %157, %158 : vector<4x1x1xf32>
      %160 = vector.broadcast %159 : vector<4x1x1xf32> to vector<4x8x32xf32>
      %161 = arith.subf %147, %160 : vector<4x8x32xf32>
      %162 = arith.mulf %161, %161 : vector<4x8x32xf32>
      %cst_51 = arith.constant dense<0.000000e+00> : vector<4x8xf32>
      %163 = vector.multi_reduction <add>, %162, %cst_51 [2] : vector<4x8x32xf32> to vector<4x8xf32>
      %164 = vector.shape_cast %163 : vector<4x8xf32> to vector<4x8x1xf32>
      %cst_52 = arith.constant dense<0.000000e+00> : vector<4x1xf32>
      %165 = vector.multi_reduction <add>, %164, %cst_52 [1] : vector<4x8x1xf32> to vector<4x1xf32>
      %166 = vector.shape_cast %165 : vector<4x1xf32> to vector<4x1x1xf32>
      %cst_53 = arith.constant 3.906250e-03 : f32
      %167 = vector.broadcast %cst_53 : f32 to vector<4x1x1xf32>
      %168 = arith.mulf %166, %167 : vector<4x1x1xf32>
      %cst_54 = arith.constant 9.99999996E-13 : f32
      %169 = vector.broadcast %cst_54 : f32 to vector<4x1x1xf32>
      %170 = arith.addf %168, %169 : vector<4x1x1xf32>
      %171 = math.rsqrt %170 : vector<4x1x1xf32>
      %172 = vector.broadcast %171 : vector<4x1x1xf32> to vector<4x8x32xf32>
      %173 = arith.mulf %161, %172 : vector<4x8x32xf32>
      %c0_55 = arith.constant 0 : index
      %c0_56 = arith.constant 0 : index
      %174 = vector.load %arg16[%c0_55, %c0_56] : memref<1x32xf32, #tpu.memory_space<vmem>>, vector<1x32xf32>
      %175 = vector.shape_cast %174 : vector<1x32xf32> to vector<1x1x32xf32>
      %176 = vector.broadcast %175 : vector<1x1x32xf32> to vector<4x8x32xf32>
      %177 = arith.mulf %173, %176 : vector<4x8x32xf32>
      %c0_57 = arith.constant 0 : index
      %c0_58 = arith.constant 0 : index
      %178 = vector.load %arg17[%c0_57, %c0_58] : memref<1x32xf32, #tpu.memory_space<vmem>>, vector<1x32xf32>
      %179 = vector.shape_cast %178 : vector<1x32xf32> to vector<1x1x32xf32>
      %180 = vector.broadcast %179 : vector<1x1x32xf32> to vector<4x8x32xf32>
      %181 = arith.addf %177, %180 : vector<4x8x32xf32>
      %c0_59 = arith.constant 0 : index
      %c0_60 = arith.constant 0 : index
      %c0_61 = arith.constant 0 : index
      %182 = vector.load %arg2[%c0_59, %c0_60, %c0_61] : memref<4x8x32xf32, #tpu.memory_space<vmem>>, vector<4x8x32xf32>
      %183 = arith.addf %181, %182 : vector<4x8x32xf32>
      %c0_62 = arith.constant 0 : index
      %c0_63 = arith.constant 0 : index
      %c0_64 = arith.constant 0 : index
      %184 = vector.load %arg18[%c0_62, %c0_63, %c0_64] : memref<4x8x32xf32, #tpu.memory_space<vmem>>, vector<4x8x32xf32>
      tpu.vector_store %arg18[%c0_62, %c0_63, %c0_64], %183 {strides = array<i32>} : memref<4x8x32xf32, #tpu.memory_space<vmem>>, vector<4x8x32xf32>,
    } else {
    }
    return
  }
  func.func @transform_0(%arg0: i32, %arg1: i32) -> (i32, i32, i32) {
    %c0_i32 = arith.constant 0 : i32
    %c0_i32_0 = arith.constant 0 : i32
    %c0_i32_1 = arith.constant 0 : i32
    return %arg0, %c0_i32, %c0_i32_0 : i32, i32, i32
  }
  func.func @transform_1(%arg0: i32, %arg1: i32) -> (i32, i32) {
    %c0_i32 = arith.constant 0 : i32
    %c0_i32_0 = arith.constant 0 : i32
    %c0_i32_1 = arith.constant 0 : i32
    return %c0_i32, %c0_i32_0 : i32, i32
  }
  func.func @transform_2(%arg0: i32, %arg1: i32) -> (i32, i32, i32) {
    %c0_i32 = arith.constant 0 : i32
    %c0_i32_0 = arith.constant 0 : i32
    %c0_i32_1 = arith.constant 0 : i32
    %c0_i32_2 = arith.constant 0 : i32
    return %c0_i32, %c0_i32_0, %c0_i32_1 : i32, i32, i32
  }
  func.func @transform_3(%arg0: i32, %arg1: i32) -> (i32, i32, i32) {
    %c0_i32 = arith.constant 0 : i32
    %c0_i32_0 = arith.constant 0 : i32
    %c0_i32_1 = arith.constant 0 : i32
    %c0_i32_2 = arith.constant 0 : i32
    return %c0_i32, %c0_i32_0, %c0_i32_1 : i32, i32, i32
  }
  func.func @transform_4(%arg0: i32, %arg1: i32) -> (i32, i32, i32) {
    %c0_i32 = arith.constant 0 : i32
    %c0_i32_0 = arith.constant 0 : i32
    %c0_i32_1 = arith.constant 0 : i32
    %c0_i32_2 = arith.constant 0 : i32
    return %c0_i32, %c0_i32_0, %c0_i32_1 : i32, i32, i32
  }
  func.func @transform_5(%arg0: i32, %arg1: i32) -> (i32, i32, i32) {
    %c0_i32 = arith.constant 0 : i32
    %c0_i32_0 = arith.constant 0 : i32
    %c0_i32_1 = arith.constant 0 : i32
    %c0_i32_2 = arith.constant 0 : i32
    return %c0_i32, %c0_i32_0, %c0_i32_1 : i32, i32, i32
  }
  func.func @transform_6(%arg0: i32, %arg1: i32) -> (i32, i32, i32) {
    %c0_i32 = arith.constant 0 : i32
    %c0_i32_0 = arith.constant 0 : i32
    %c0_i32_1 = arith.constant 0 : i32
    %c0_i32_2 = arith.constant 0 : i32
    return %c0_i32, %c0_i32_0, %c0_i32_1 : i32, i32, i32
  }
  func.func @transform_7(%arg0: i32, %arg1: i32) -> (i32, i32, i32) {
    %c0_i32 = arith.constant 0 : i32
    %c0_i32_0 = arith.constant 0 : i32
    %c0_i32_1 = arith.constant 0 : i32
    %c0_i32_2 = arith.constant 0 : i32
    return %c0_i32, %c0_i32_0, %c0_i32_1 : i32, i32, i32
  }
  func.func @transform_8(%arg0: i32, %arg1: i32) -> (i32, i32, i32) {
    %c0_i32 = arith.constant 0 : i32
    %c0_i32_0 = arith.constant 0 : i32
    %c0_i32_1 = arith.constant 0 : i32
    %c0_i32_2 = arith.constant 0 : i32
    return %c0_i32, %c0_i32_0, %c0_i32_1 : i32, i32, i32
  }
  func.func @transform_9(%arg0: i32, %arg1: i32) -> (i32, i32, i32) {
    %c0_i32 = arith.constant 0 : i32
    %c0_i32_0 = arith.constant 0 : i32
    %c0_i32_1 = arith.constant 0 : i32
    %c0_i32_2 = arith.constant 0 : i32
    return %c0_i32, %c0_i32_0, %c0_i32_1 : i32, i32, i32
  }
  func.func @transform_10(%arg0: i32, %arg1: i32) -> (i32, i32, i32) {
    %c0_i32 = arith.constant 0 : i32
    %c0_i32_0 = arith.constant 0 : i32
    %c0_i32_1 = arith.constant 0 : i32
    %c0_i32_2 = arith.constant 0 : i32
    return %c0_i32, %c0_i32_0, %c0_i32_1 : i32, i32, i32
  }
  func.func @transform_11(%arg0: i32, %arg1: i32) -> (i32, i32, i32) {
    %c0_i32 = arith.constant 0 : i32
    %c0_i32_0 = arith.constant 0 : i32
    %c0_i32_1 = arith.constant 0 : i32
    %c0_i32_2 = arith.constant 0 : i32
    return %c0_i32, %c0_i32_0, %c0_i32_1 : i32, i32, i32
  }
  func.func @transform_12(%arg0: i32, %arg1: i32) -> (i32, i32, i32) {
    %c0_i32 = arith.constant 0 : i32
    %c0_i32_0 = arith.constant 0 : i32
    %c0_i32_1 = arith.constant 0 : i32
    %c0_i32_2 = arith.constant 0 : i32
    return %c0_i32, %c0_i32_0, %c0_i32_1 : i32, i32, i32
  }
  func.func @transform_13(%arg0: i32, %arg1: i32) -> (i32, i32, i32) {
    %c0_i32 = arith.constant 0 : i32
    %c0_i32_0 = arith.constant 0 : i32
    %c0_i32_1 = arith.constant 0 : i32
    %c0_i32_2 = arith.constant 0 : i32
    return %c0_i32, %c0_i32_0, %c0_i32_1 : i32, i32, i32
  }
  func.func @transform_14(%arg0: i32, %arg1: i32) -> (i32, i32) {
    %c0_i32 = arith.constant 0 : i32
    %c0_i32_0 = arith.constant 0 : i32
    %c0_i32_1 = arith.constant 0 : i32
    return %c0_i32, %c0_i32_0 : i32, i32
  }
  func.func @transform_15(%arg0: i32, %arg1: i32) -> (i32, i32) {
    %c0_i32 = arith.constant 0 : i32
    %c0_i32_0 = arith.constant 0 : i32
    %c0_i32_1 = arith.constant 0 : i32
    return %c0_i32, %c0_i32_0 : i32, i32
  }
  func.func @transform_16(%arg0: i32, %arg1: i32) -> (i32, i32, i32) {
    %c0_i32 = arith.constant 0 : i32
    %c0_i32_0 = arith.constant 0 : i32
    %c0_i32_1 = arith.constant 0 : i32
    return %arg0, %c0_i32, %c0_i32_0 : i32, i32, i32
  }
}

</mosaic_0001>

<bundles_post_ra>
// kernel: intra_transformer_forward.1
= control target key start
LH: loop header
LB: loop body
LE: loop exit
PB: predicated region body
PF: predicated region fallthrough
CT: control target
= control target key end

     0   :  { %s4749_s0 = inlined_call_operand.vmem [shape: f32[8,8,32], index: 0, kind: input, shape index: {}]   ;;  %s4750_s1 = inlined_call_operand.vmem [shape: f32[8,32], index: 1, kind: input, shape index: {}]   ;;  %s4751_s2 = inlined_call_operand.vmem [shape: bf16[2,32,96], index: 2, kind: input, shape index: {}]   ;;  %s4752_s3 = inlined_call_operand.vmem [shape: f32[2,1,96], index: 3, kind: input, shape index: {}]   ;;  %s4753_s4 = inlined_call_operand.vmem [shape: bf16[2,32,32], index: 4, kind: input, shape index: {}]   ;;  %s4754_s5 = inlined_call_operand.vmem [shape: f32[2,1,32], index: 5, kind: input, shape index: {}]   ;;  %s4755_s6 = inlined_call_operand.vmem [shape: bf16[2,32,64], index: 6, kind: input, shape index: {}]   ;;  %s4756_s7 = inlined_call_operand.vmem [shape: f32[2,1,64], index: 7, kind: input, shape index: {}]   ;;  %s4757_s8 = inlined_call_operand.vmem [shape: bf16[2,64,32], index: 8, kind: input, shape index: {}]   ;;  %s4758_s9 = inlined_call_operand.vmem [shape: f32[2,1,32], index: 9, kind: input, shape index: {}]   ;;  %s4759_s10 = inlined_call_operand.vmem [shape: f32[2,1,32], index: 10, kind: input, shape index: {}]   ;;  %s4760_s11 = inlined_call_operand.vmem [shape: f32[2,1,32], index: 11, kind: input, shape index: {}]   ;;  %s4761_s12 = inlined_call_operand.vmem [shape: f32[2,1,32], index: 12, kind: input, shape index: {}]   ;;  %s4762_s13 = inlined_call_operand.vmem [shape: f32[2,1,32], index: 13, kind: input, shape index: {}]   ;;  %s4763_s14 = inlined_call_operand.vmem [shape: f32[1,32], index: 14, kind: input, shape index: {}]   ;;  %s4764_s15 = inlined_call_operand.vmem [shape: f32[1,32], index: 15, kind: input, shape index: {}]   ;;  %s4765_s16 = inlined_call_operand.hbm [shape: f32[8,8,32], index: 16, kind: output, shape index: {}]  }
   0x1   :  { %4776 = sst [smem:[#allocation12_spill]] %s4749_s0 }
   0x2   :  { %4777 = sst [smem:[#allocation13_spill]] %s4750_s1 }
   0x3   :  { %4778 = sst [smem:[#allocation14_spill]] %s4764_s15 }
   0x4   :  { %4779 = sst [smem:[#allocation15_spill]] %s4765_s16 }
   0x5   :  { %21 = vsyncpa [#allocation3], 0 }
   0x6   :  { %23 = vsyncpa [#allocation3 + $0x1], 0  ;;  %s3992_s21 = smov 0   ;;  %s3994_s22 = smov 0  }
   0x7   :  { %s3996_s23 = smov 0   ;;  %s3998_s24 = smov 0  }
   0x8   :  { %s4000_s25 = smov 0   ;;  %s4002_s26 = smov 0  }
   0x9   :  { %s4004_s27 = smov 0   ;;  %s4006_s28 = smov 0  }
   0xa LB: > { %4780 = sst [smem:[#allocation5_spill]] %s3865_s21  ;;  %s3168_s29 = sadd.s32 4294967295, %s3893_s28   ;;  %s3893_s28 = sphi %s4006_s28, %s29_s28   ;;  %s3889_s27 = sphi %s4004_s27, %s4806_s27   ;;  %s3885_s26 = sphi %s4002_s26, %s4800_s26   ;;  %s3881_s25 = sphi %s4000_s25, %s4805_s25   ;;  %s3877_s24 = sphi %s3998_s24, %s4799_s24   ;;  %s3873_s23 = sphi %s3996_s23, %s4804_s23   ;;  %s3869_s22 = sphi %s3994_s22, %s4803_s22   ;;  %s3865_s21 = sphi %s3992_s21, %s4802_s21  }
   0xb   : > { %4781 = sst [smem:[#allocation6_spill]] %s3885_s26  ;;  %s3169_s30 = sadd.s32 4294967294, %s3893_s28  }
   0xc   : > { %4782 = sst [smem:[#allocation7_spill]] %s3893_s28  ;;  %s38_s0 = sadd.s32 1, %s3885_s26 }
   0xd   : > { %p39_p0 = scmp.ge.s32.totalorder %s38_s0, 2  ;;  %s41_s17 = sadd.s32 1, %s3889_s27 }
   0xe   : > { %p399_p1 = scmp.ne.s32.totalorder %s3873_s23, %s3869_s22  ;;  %p400_p2 = scmp.eq.s32.totalorder %s3168_s29, 3 }
   0xf   : > { %s4808_s0 = smov (%p39_p0, %s38_s0), 0  ;;  %s4810_s17 = smov (!%p39_p0, %s41_s17), %s3889_s27 }
  0x10   : > { %4783 = sst [smem:[#allocation8_spill]] %s4808_s0  ;;  %p4041_p3 = por %p400_p2, %p399_p1 }
  0x11   : > { %p405_p4 = scmp.ne.s32.totalorder %s3869_s22, %s3865_s21  ;;  %p43_p5 = scmp.ge.s32.totalorder %s4810_s17, 2 }
  0x12   : > { %s4784_s18 = scalar_select %p4041_p3, 1, 0 }
  0x13   : > { %p406_p6 = scmp.eq.s32.totalorder %s3169_s30, 3  ;;  %p3172_p7 = scmp.ge.s32.totalorder %s3893_s28, 1 }
  0x14   : > { %4785 = sst [smem:[#allocation9_spill]] %s4784_s18  ;;  %p478_p8 = scmp.lt.s32.totalorder %s3893_s28, 5 }
  0x15   : > { %s4812_s17 = smov (%p43_p5, %s4810_s17), 0  ;;  %p4051_p9 = por %p406_p6, %p405_p4 }
  0x16   : > { %4786 = sst [smem:[#allocation10_spill]] %s4812_s17  ;;  %p479_p10 = pnand %p3172_p7, %p478_p8 }
  0x17   : > { %s4787_s19 = scalar_select %p4051_p9, 1, 0 }
  0x18   : > { %s386_s20 = ssub.s32 %s3889_s27, %s4812_s17  ;;  %s389_s29 = sadd.s32 1, %s3873_s23 }
  0x19   : > { %4788 = sst [smem:[#allocation11_spill]] %s4787_s19  ;;  %p387_p11 = scmp.eq.s32.totalorder %s386_s20, 0 }
  0x1a   : > { %482 = sbr.rel (%p479_p10) target bundleno = 3136 (0xc40), region = 84  ;;  %s525_s30 = sand.u32 (!%p479_p10), 1, %s3869_s22  }
  0x1b   : > { %s4059_s0 = scalar_select %p387_p11, %s3873_s23, %s389_s29  }
  0x1c   : > { %s3174_s26 = sshll.u32 (!%p479_p10), %s3881_s25, 2  ;;  %s3173_s21 = sshll.u32 (!%p479_p10), %s525_s30, 5 }
  0x1d   : > { %p529_p12 = scmp.lt.s32.totalorder (!%p479_p10), %s3174_s26, 7  ;;  %s4789_s19 = sld [smem:[#allocation12_spill]] (!%p479_p10) }
  0x1e   : > { %s4070_s17 = scalar_lea.vmem (!%p479_p10), [#allocation2], %s3173_s21  ;;  %p3176_p13 = scmp.ne.s32.totalorder (!%p479_p10), %s3877_s24, 0 }
  0x21   : > { %s4814_s26 = smov (!%p529_p12, %s3174_s26), 7  ;;  %539 = sbr.rel (%p3176_p13) target bundleno = 45 (0x2d), region = 88 }
  0x22   : > { %s3175_s28 = sshll.u32 %s4814_s26, 3  ;;  %s4790_s1 = sld [smem:[#allocation13_spill]] (!%p3176_p13)  ;;  %vm553_vm0 = vcmask (!%p3176_p13), 261120  }
  0x23   : > { %s4068_s15 = scalar_lea.vmem %s4789_s19, %s3175_s28 }
  0x24   : > { %v540_v0 = vld [vmem:[%s4068_s15] sm:$0xff] (!%p3176_p13)  ;;  %v541_v2 = vld [vmem:[%s4068_s15 + $0x8] sm:$0xff] (!%p3176_p13)  ;;  %v542_v5 = vld [vmem:[%s4068_s15 + $0x10] sm:$0xff] (!%p3176_p13) }
  0x25   : > { %v544_v3 = vmul.f32 (!%p3176_p13), 2.0, %v540_v0  ;;  %v545_v4 = vmul.f32 (!%p3176_p13), 2.0, %v541_v2  ;;  %v543_v6 = vld [vmem:[%s4068_s15 + $0x18] sm:$0xff] (!%p3176_p13)  ;;  %v546_v7 = vmul.f32 (!%p3176_p13), 2.0, %v542_v5 }
  0x26   : > { %v547_v8 = vmul.f32 (!%p3176_p13), 2.0, %v543_v6 }
  0x28   : > { %v548_v1 = vld [vmem:[%s4790_s1] sm:$0xff] }
  0x29   : > { %v549_v9 = vadd.f32 %v548_v1, %v544_v3  ;;  %v550_v10 = vadd.f32 %v548_v1, %v545_v4  ;;  %v551_v11 = vadd.f32 %v548_v1, %v546_v7  ;;  %v552_v12 = vadd.f32 %v548_v1, %v547_v8 }
  0x2b   : > { %554 = vst.msk [vmem:[%s4070_s17] sm:$0xff] %vm553_vm0, %v549_v9  ;;  %555 = vst.msk [vmem:[%s4070_s17 + $0x8] sm:$0xff] %vm553_vm0, %v550_v10 }
  0x2c   : > { %556 = vst.msk [vmem:[%s4070_s17 + $0x10] sm:$0xff] %vm553_vm0, %v551_v11  ;;  %557 = vst.msk [vmem:[%s4070_s17 + $0x18] sm:$0xff] %vm553_vm0, %v552_v12 }
  0x2d PF: > { %s4085_s16 = sshll.u32 %s3877_s24, 4  ;;  %vm628_vm1 = vcmask 261120   ;;  %s569_s20 = scalar_lea.vmem %s4752_s3, %s3877_s24  ;;  %v3895_v32 = vmov 0.0   ;;  %vm3898_vm2 = vmmov 0   ;;  %vm734_vm3 = vcmask 64512  }
  0x2e   : > { %s564_s28 = scalar_lea.vmem %s4751_s2, %s4085_s16  ;;  %v3183_v22 = vld [vmem:[%s569_s20] ss:$0 sm:$0xff]  ;;  %3365 = vmatprep.subr.bf16.mxu1 %v3895_v32  ;;  %s3896_s29 = smov 112   ;;  %3367 = vmatprep.mubr.msk.bf16.mxu1 %vm3898_vm2, %v3895_v32  ;;  %vm1698_vm4 = vcmask 1043456   ;;  %vm2514_vm5 = vcmask 130048   ;;  %vm2519_vm6 = vcmask 195584  }
  0x2f   : > { %v3697_v16 = vld [vmem:[%s564_s28] sm:$0xff]   ;;  %v3698_v17 = vld [vmem:[%s564_s28 + $0x8] sm:$0xff]   ;;  %s3897_s21 = smov 120   ;;  %s3899_s26 = smov 104   ;;  %vm2787_vm7 = vcmask 523264  }
  0x30   : > { %3357 = vmatprep.subr.bf16.mxu0 %v3697_v16  ;;  %s3900_s28 = smov 96   ;;  %s3901_s18 = smov 64  }
  0x31   : > { %3358 = vmatpush3.bf16.msra.mxu0 %v3697_v16  ;;  %s4775_s19 = smov 8   ;;  %s3903_s20 = smov 16  }
  0x32   : > { %v558_v13 = vld [vmem:[%s4070_s17] sm:$0xff]  ;;  %v559_v14 = vld [vmem:[%s4070_s17 + $0x8] sm:$0xff]  ;;  %3359 = vmatprep.subr.bf16.mxu0 %v3698_v17  ;;  %p3257_p0 = scmp.ge.s32.totalorder %s3877_s24, 1 }
  0x33   : > { %v608_v15 = vpack.c.bf16 %v559_v14, %v558_v13  ;;  %v560_v18 = vld [vmem:[%s4070_s17 + $0x10] sm:$0xff]  ;;  %v561_v19 = vld [vmem:[%s4070_s17 + $0x18] sm:$0xff] }
  0x34   : > { %v609_v20 = vpack.c.bf16 %v561_v19, %v560_v18 }
  0x35   : > { %3361 = vmatprep.mubr.msk.bf16.mxu0 %vm628_vm1, %v608_v15  ;;  %3360 = vmatpush3.bf16.msra.mxu0 %v3698_v17 }
  0x36   : > { %3371 = vmatprep.subr.bf16.mxu0 %v3895_v32 }
  0x38   : > { %3362 = vmatmul.mubr.msk.bf16.vlgmr.msra.gmra.mrb[0].mxu0 %vm628_vm1, %v609_v20 }
  0x39   : > { %3373 = vmatprep.mubr.msk.bf16.mxu0 %vm3898_vm2, %v3895_v32 }
 0x10b   : > { %v3363_v21 = vpop.f32.mrb[0].mxu0 }
 0x10c   : > { %v669_v23 = vpop.f32.mrb[1].mxu0  ;;  %v678_v25 = vadd.f32 %v3363_v21, %v3183_v22 }
 0x10d   : > { %v3364_v24 = vpop.f32.mrb[2].mxu0  ;;  %v670_v28 = vadd.f32 %v3183_v22, %v669_v23 }
 0x10e   : > { %v681_v26 = vadd.f32 %v3364_v24, %v3183_v22  ;;  %v672_v27 = vpop.f32.mrb[3].mxu0  ;;  %v3272_v35 = vpack.c.bf16 %v678_v25, %v678_v25 }
 0x10f   : > { %v673_v29 = vadd.f32 %v3183_v22, %v672_v27  ;;  %v3270_v33 = vpack.c.bf16 %v670_v28, %v670_v28 }
 0x110   : > { %v685_v30 = vpack.c.bf16 %v681_v26, %v678_v25  ;;  %v3273_v36 = vpack.c.bf16 %v681_v26, %v681_v26 }
 0x111   : > { %v684_v31 = vpack.c.bf16 %v673_v29, %v670_v28  ;;  %v3271_v34 = vpack.c.bf16 %v673_v29, %v673_v29 }
 0x113   : > { %692 = vrot.lane.b32.xlu1 %v684_v31, %s3896_s29  ;;  %688 = vrot.lane.b32.xlu0 %v684_v31, %s3897_s21 }
 0x117   : > { %694 = vrot.lane.b32.xlu1 %v685_v30, %s3896_s29  ;;  %690 = vrot.lane.b32.xlu0 %v685_v30, %s3897_s21  ;;  %s577_s29 = scalar_lea.vmem %s4754_s5, %s3877_s24  ;;  %s585_s21 = scalar_lea.vmem %s4756_s7, %s3877_s24 }
 0x11b   : > { %698 = vrot.lane.b32.xlu1 %v685_v30, %s3899_s26  ;;  %696 = vrot.lane.b32.xlu0 %v684_v31, %s3899_s26  ;;  %s572_s26 = scalar_lea.vmem %s4753_s4, %s4085_s16 }
 0x11f   : > { %781 = vrot.lane.b32.xlu1 %v3271_v34, %s3900_s28  ;;  %732 = vrot.lane.b32.xlu0 %v3270_v33, %s3900_s28 }
 0x123   : > { %877 = vrot.lane.b32.xlu1 %v3273_v36, %s3900_s28  ;;  %829 = vrot.lane.b32.xlu0 %v3272_v35, %s3900_s28 }
 0x185   : > { %v693_v37 = vpop.permute.xlu1 %692  ;;  %v689_v38 = vpop.permute.xlu0 %688 }
 0x186   : > { %v4111_v39 = vcombine.low %v689_v38, %v689_v38  ;;  %v4113_v40 = vcombine.high %v689_v38, %v689_v38  ;;  %v4127_v47 = vcombine.low %v693_v37, %v693_v37  ;;  %v4129_v48 = vcombine.high %v693_v37, %v693_v37 }
 0x188   : > { %973 = vrot.lane.b32.xlu1 %v4113_v40, %s3900_s28  ;;  %925 = vrot.lane.b32.xlu0 %v4111_v39, %s3900_s28 }
 0x189   : > { %v695_v41 = vpop.permute.xlu1 %694  ;;  %v691_v42 = vpop.permute.xlu0 %690 }
 0x18a   : > { %v4119_v43 = vcombine.low %v691_v42, %v691_v42  ;;  %v4121_v44 = vcombine.high %v691_v42, %v691_v42  ;;  %v4135_v51 = vcombine.low %v695_v41, %v695_v41  ;;  %v4137_v52 = vcombine.high %v695_v41, %v695_v41 }
 0x18c   : > { %1069 = vrot.lane.b32.xlu1 %v4121_v44, %s3900_s28  ;;  %1021 = vrot.lane.b32.xlu0 %v4119_v43, %s3900_s28 }
 0x18d   : > { %v699_v45 = vpop.permute.xlu1 %698  ;;  %v697_v46 = vpop.permute.xlu0 %696 }
 0x18e   : > { %v4147_v55 = vcombine.low %v697_v46, %v697_v46  ;;  %v4149_v56 = vcombine.high %v697_v46, %v697_v46  ;;  %v4155_v59 = vcombine.low %v699_v45, %v699_v45  ;;  %v4157_v60 = vcombine.high %v699_v45, %v699_v45 }
 0x190   : > { %1165 = vrot.lane.b32.xlu1 %v4129_v48, %s3900_s28  ;;  %1117 = vrot.lane.b32.xlu0 %v4127_v47, %s3900_s28 }
 0x191   : > { %v782_v49 = vpop.permute.xlu1 %781  ;;  %v733_v50 = vpop.permute.xlu0 %732 }
 0x192   : > { %v787_v53 = vsel %vm734_vm3, %v782_v49, 0  ;;  %v739_v54 = vsel %vm734_vm3, %v733_v50, 0 }
 0x193   : > { %3366 = vmatpush3.bf16.xpose.msra.mxu1 %v739_v54  ;;  %3372 = vmatpush3.bf16.xpose.msra.mxu0 %v787_v53 }
 0x194   : > { %1261 = vrot.lane.b32.xlu1 %v4137_v52, %s3900_s28  ;;  %1213 = vrot.lane.b32.xlu0 %v4135_v51, %s3900_s28 }
 0x195   : > { %3377 = vmatprep.subr.bf16.mxu1 %v3895_v32  ;;  %3383 = vmatprep.subr.bf16.mxu0 %v3895_v32  ;;  %v878_v57 = vpop.permute.xlu1 %877  ;;  %v830_v58 = vpop.permute.xlu0 %829 }
 0x196   : > { %v883_v61 = vsel %vm734_vm3, %v878_v57, 0  ;;  %v835_v62 = vsel %vm734_vm3, %v830_v58, 0 }
 0x198   : > { %1357 = vrot.lane.b32.xlu1 %v4149_v56, %s3900_s28  ;;  %1309 = vrot.lane.b32.xlu0 %v4147_v55, %s3900_s28 }
 0x19a   : > { %3368 = vmatmul.mubr.msk.bf16.vlgmr.msra.gmra.mrb[0].mxu1 %vm734_vm3, %v3270_v33  ;;  %3374 = vmatmul.mubr.msk.bf16.vlgmr.msra.gmra.mrb[4].mxu0 %vm734_vm3, %v3271_v34 }
 0x19b   : > { %3378 = vmatpush3.bf16.xpose.msra.mxu1 %v835_v62  ;;  %3384 = vmatpush3.bf16.xpose.msra.mxu0 %v883_v61 }
 0x19c   : > { %1453 = vrot.lane.b32.xlu1 %v4157_v60, %s3900_s28  ;;  %1405 = vrot.lane.b32.xlu0 %v4155_v59, %s3900_s28  ;;  %s3904_s28 = smov 24  }
 0x19d   : > { %3379 = vmatprep.mubr.msk.bf16.mxu1 %vm3898_vm2, %v3895_v32  ;;  %3385 = vmatprep.mubr.msk.bf16.mxu0 %vm3898_vm2, %v3895_v32 }
 0x19e   : > { %3389 = vmatprep.subr.bf16.mxu1 %v3895_v32  ;;  %3395 = vmatprep.subr.bf16.mxu0 %v3895_v32 }
 0x1a0   : > { %1693 = vrot.lane.b32.xlu1 %v3270_v33, %s3901_s18  ;;  %1742 = vrot.lane.b32.xlu0 %v3271_v34, %s3901_s18 }
 0x1a2   : > { %3380 = vmatmul.mubr.msk.bf16.vlgmr.msra.gmra.mrb[4].mxu1 %vm734_vm3, %v3272_v35  ;;  %3386 = vmatmul.mubr.msk.bf16.vlgmr.msra.gmra.mrb[8].mxu0 %vm734_vm3, %v3273_v36 }
 0x1a3   : > { %3397 = vmatprep.mubr.msk.bf16.mxu0 %vm3898_vm2, %v3895_v32  ;;  %3391 = vmatprep.mubr.msk.bf16.mxu1 %vm3898_vm2, %v3895_v32 }
 0x1a4   : > { %1790 = vrot.lane.b32.xlu1 %v3272_v35, %s3901_s18  ;;  %1838 = vrot.lane.b32.xlu0 %v3273_v36, %s3901_s18 }
 0x1a8   : > { %1982 = vrot.lane.b32.xlu1 %v4119_v43, %s3901_s18  ;;  %2030 = vrot.lane.b32.xlu0 %v4121_v44, %s3901_s18 }
 0x1ac   : > { %1886 = vrot.lane.b32.xlu1 %v4111_v39, %s3901_s18  ;;  %1934 = vrot.lane.b32.xlu0 %v4113_v40, %s3901_s18 }
 0x1b0   : > { %2078 = vrot.lane.b32.xlu1 %v4127_v47, %s3901_s18 }
 0x1fa   : > { %v974_v63 = vpop.permute.xlu1 %973  ;;  %v926_v0 = vpop.permute.xlu0 %925 }
 0x1fb   : > { %v979_v1 = vsel %vm734_vm3, %v974_v63, 0  ;;  %v931_v2 = vsel %vm734_vm3, %v926_v0, 0 }
 0x1fc   : > { %3390 = vmatpush3.bf16.xpose.msra.mxu1 %v931_v2  ;;  %3396 = vmatpush3.bf16.xpose.msra.mxu0 %v979_v1 }
 0x1fd   : > { %3401 = vmatprep.subr.bf16.mxu1 %v3895_v32  ;;  %3407 = vmatprep.subr.bf16.mxu0 %v3895_v32 }
 0x1fe   : > { %v1070_v3 = vpop.permute.xlu1 %1069  ;;  %v1022_v4 = vpop.permute.xlu0 %1021 }
 0x1ff   : > { %v1075_v5 = vsel %vm734_vm3, %v1070_v3, 0  ;;  %v1027_v6 = vsel %vm734_vm3, %v1022_v4, 0 }
 0x202   : > { %v1166_v7 = vpop.permute.xlu1 %1165  ;;  %v1118_v8 = vpop.permute.xlu0 %1117 }
 0x203   : > { %3392 = vmatmul.mubr.msk.bf16.vlgmr.msra.gmra.mrb[8].mxu1 %vm734_vm3, %v4111_v39  ;;  %3398 = vmatmul.mubr.msk.bf16.vlgmr.msra.gmra.mrb[12].mxu0 %vm734_vm3, %v4113_v40  ;;  %v1171_v9 = vsel %vm734_vm3, %v1166_v7, 0  ;;  %v1123_v10 = vsel %vm734_vm3, %v1118_v8, 0 }
 0x204   : > { %3402 = vmatpush3.bf16.xpose.msra.mxu1 %v1027_v6  ;;  %3408 = vmatpush3.bf16.xpose.msra.mxu0 %v1075_v5 }
 0x205   : > { %3409 = vmatprep.mubr.msk.bf16.mxu0 %vm3898_vm2, %v3895_v32  ;;  %3403 = vmatprep.mubr.msk.bf16.mxu1 %vm3898_vm2, %v3895_v32 }
 0x206   : > { %3413 = vmatprep.subr.bf16.mxu1 %v3895_v32  ;;  %3419 = vmatprep.subr.bf16.mxu0 %v3895_v32  ;;  %v1262_v11 = vpop.permute.xlu1 %1261  ;;  %v1214_v12 = vpop.permute.xlu0 %1213 }
 0x207   : > { %v1267_v13 = vsel %vm734_vm3, %v1262_v11, 0  ;;  %v1219_v14 = vsel %vm734_vm3, %v1214_v12, 0 }
 0x20a   : > { %v1358_v15 = vpop.permute.xlu1 %1357  ;;  %v1310_v16 = vpop.permute.xlu0 %1309 }
 0x20b   : > { %3404 = vmatmul.mubr.msk.bf16.vlgmr.msra.gmra.mrb[12].mxu1 %vm734_vm3, %v4119_v43  ;;  %3410 = vmatmul.mubr.msk.bf16.vlgmr.msra.gmra.mrb[16].mxu0 %vm734_vm3, %v4121_v44  ;;  %v1363_v17 = vsel %vm734_vm3, %v1358_v15, 0  ;;  %v1315_v18 = vsel %vm734_vm3, %v1310_v16, 0 }
 0x20c   : > { %3414 = vmatpush3.bf16.xpose.msra.mxu1 %v1123_v10  ;;  %3420 = vmatpush3.bf16.xpose.msra.mxu0 %v1171_v9 }
 0x20d   : > { %3421 = vmatprep.mubr.msk.bf16.mxu0 %vm3898_vm2, %v3895_v32  ;;  %3415 = vmatprep.mubr.msk.bf16.mxu1 %vm3898_vm2, %v3895_v32 }
 0x20e   : > { %3425 = vmatprep.subr.bf16.mxu1 %v3895_v32  ;;  %3431 = vmatprep.subr.bf16.mxu0 %v3895_v32  ;;  %v1454_v19 = vpop.permute.xlu1 %1453  ;;  %v1406_v20 = vpop.permute.xlu0 %1405 }
 0x20f   : > { %v1459_v21 = vsel %vm734_vm3, %v1454_v19, 0  ;;  %v1411_v22 = vsel %vm734_vm3, %v1406_v20, 0 }
 0x212   : > { %v1694_v23 = vpop.permute.xlu1 %1693  ;;  %v1743_v24 = vpop.permute.xlu0 %1742 }
 0x213   : > { %3416 = vmatmul.mubr.msk.bf16.vlgmr.msra.gmra.mrb[16].mxu1 %vm734_vm3, %v4127_v47  ;;  %3422 = vmatmul.mubr.msk.bf16.vlgmr.msra.gmra.mrb[20].mxu0 %vm734_vm3, %v4129_v48  ;;  %v1700_v25 = vsel %vm1698_vm4, %v1694_v23, 0  ;;  %v1748_v26 = vsel %vm1698_vm4, %v1743_v24, 0 }
 0x214   : > { %3426 = vmatpush3.bf16.xpose.msra.mxu1 %v1219_v14  ;;  %3432 = vmatpush3.bf16.xpose.msra.mxu0 %v1267_v13 }
 0x215   : > { %3433 = vmatprep.mubr.msk.bf16.mxu0 %vm3898_vm2, %v3895_v32  ;;  %3427 = vmatprep.mubr.msk.bf16.mxu1 %vm3898_vm2, %v3895_v32 }
 0x216   : > { %3437 = vmatprep.subr.bf16.mxu1 %v3895_v32  ;;  %3443 = vmatprep.subr.bf16.mxu0 %v3895_v32  ;;  %v4301_v11 = vpop.permute.xlu0 %1838 }
 0x21b   : > { %3428 = vmatmul.mubr.msk.bf16.vlgmr.msra.gmra.mrb[20].mxu1 %vm734_vm3, %v4135_v51  ;;  %3434 = vmatmul.mubr.msk.bf16.vlgmr.msra.gmra.mrb[24].mxu0 %vm734_vm3, %v4137_v52 }
 0x21c   : > { %3438 = vmatpush3.bf16.xpose.msra.mxu1 %v1315_v18  ;;  %3444 = vmatpush3.bf16.xpose.msra.mxu0 %v1363_v17 }
 0x21d   : > { %3445 = vmatprep.mubr.msk.bf16.mxu0 %vm3898_vm2, %v3895_v32  ;;  %3439 = vmatprep.mubr.msk.bf16.mxu1 %vm3898_vm2, %v3895_v32 }
 0x21e   : > { %3449 = vmatprep.subr.bf16.mxu1 %v3895_v32  ;;  %3455 = vmatprep.subr.bf16.mxu0 %v3895_v32 }
 0x223   : > { %3440 = vmatmul.mubr.msk.bf16.vlgmr.msra.gmra.mrb[24].mxu1 %vm734_vm3, %v4147_v55  ;;  %3446 = vmatmul.mubr.msk.bf16.vlgmr.msra.gmra.mrb[28].mxu0 %vm734_vm3, %v4149_v56 }
 0x224   : > { %3450 = vmatpush3.bf16.xpose.msra.mxu1 %v1411_v22  ;;  %3456 = vmatpush3.bf16.xpose.msra.mxu0 %v1459_v21  ;;  %v4311_v22 = vpop.permute.xlu0 %2030 }
 0x225   : > { %3451 = vmatprep.mubr.msk.bf16.mxu1 %vm3898_vm2, %v3895_v32  ;;  %3457 = vmatprep.mubr.msk.bf16.mxu0 %vm3898_vm2, %v3895_v32 }
 0x226   : > { %3461 = vmatprep.subr.bf16.mxu1 %v3895_v32  ;;  %3467 = vmatprep.subr.bf16.mxu0 %v3895_v32 }
 0x22b   : > { %3452 = vmatmul.mubr.msk.bf16.vlgmr.msra.gmra.mrb[28].mxu1 %vm734_vm3, %v4155_v59  ;;  %3458 = vmatmul.mubr.msk.bf16.vlgmr.msra.gmra.mrb[32].mxu0 %vm734_vm3, %v4157_v60 }
 0x22c   : > { %3462 = vmatpush3.bf16.msra.mxu1 %v1700_v25  ;;  %3468 = vmatpush3.bf16.msra.mxu0 %v1748_v26 }
 0x22d   : > { %3463 = vmatprep.mubr.msk.bf16.mxu1 %vm3898_vm2, %v3895_v32  ;;  %3473 = vmatprep.subr.bf16.mxu1 %v3895_v32 }
 0x22e   : > { %3469 = vmatprep.mubr.msk.bf16.mxu0 %vm3898_vm2, %v3895_v32  ;;  %3479 = vmatprep.subr.bf16.mxu0 %v3895_v32 }
 0x26d   : > { %v4269_v27 = vpop.f32.mrb[0].mxu1  ;;  %v4271_v28 = vpop.f32.mrb[4].mxu0 }
 0x26e   : > { %v3369_v29 = vpop.f32.mrb[1].mxu1  ;;  %v3375_v30 = vpop.f32.mrb[5].mxu0  ;;  %v1504_v31 = vsel %vm734_vm3, %v4271_v28, -inf  ;;  %v1501_v33 = vsel %vm734_vm3, %v4269_v27, -inf }
 0x26f   : > { %v826_v34 = vpop.f32.mrb[6].mxu0  ;;  %1505 = vmax.xlane.f32.xlu1 %v1504_v31  ;;  %1502 = vmax.xlane.f32.xlu0 %v1501_v33  ;;  %v778_v35 = vpop.f32.mrb[2].mxu1 }
 0x270   : > { %v3370_v36 = vpop.f32.mrb[3].mxu1  ;;  %v3376_v37 = vpop.f32.mrb[7].mxu0 }
 0x271   : > { %v4321_v36 = vpop.permute.xlu0 %1934 }
 0x275   : > { %v4277_v38 = vpop.f32.mrb[4].mxu1  ;;  %v4279_v39 = vpop.f32.mrb[8].mxu0 }
 0x276   : > { %v3381_v40 = vpop.f32.mrb[5].mxu1  ;;  %v3387_v41 = vpop.f32.mrb[9].mxu0  ;;  %v1507_v42 = vsel %vm734_vm3, %v4277_v38, -inf  ;;  %v1510_v47 = vsel %vm734_vm3, %v4279_v39, -inf }
 0x277   : > { %v922_v43 = vpop.f32.mrb[10].mxu0  ;;  %1508 = vmax.xlane.f32.xlu0 %v1507_v42  ;;  %v874_v44 = vpop.f32.mrb[6].mxu1 }
 0x278   : > { %v3382_v45 = vpop.f32.mrb[7].mxu1  ;;  %v3388_v46 = vpop.f32.mrb[11].mxu0 }
 0x27b   : > { %1511 = vmax.xlane.f32.xlu0 %v1510_v47 }
 0x2d6   : > { %v4285_v49 = vpop.f32.mrb[8].mxu1  ;;  %v4287_v50 = vpop.f32.mrb[12].mxu0 }
 0x2d7   : > { %v3393_v53 = vpop.f32.mrb[9].mxu1  ;;  %v3399_v54 = vpop.f32.mrb[13].mxu0  ;;  %v1516_v57 = vsel %vm734_vm3, %v4287_v50, -inf  ;;  %v1513_v58 = vsel %vm734_vm3, %v4285_v49, -inf }
 0x2d8   : > { %v1018_v61 = vpop.f32.mrb[14].mxu0  ;;  %1517 = vmax.xlane.f32.xlu0 %v1516_v57  ;;  %1514 = vmax.xlane.f32.xlu1 %v1513_v58  ;;  %v970_v62 = vpop.f32.mrb[10].mxu1 }
 0x2d9   : > { %v3394_v63 = vpop.f32.mrb[11].mxu1  ;;  %v3400_v0 = vpop.f32.mrb[15].mxu0 }
 0x2de   : > { %v4293_v1 = vpop.f32.mrb[12].mxu1  ;;  %v4295_v2 = vpop.f32.mrb[16].mxu0 }
 0x2df   : > { %v3405_v3 = vpop.f32.mrb[13].mxu1  ;;  %v3411_v4 = vpop.f32.mrb[17].mxu0  ;;  %v1522_v5 = vsel %vm734_vm3, %v4295_v2, -inf  ;;  %v1519_v6 = vsel %vm734_vm3, %v4293_v1, -inf }
 0x2e0   : > { %v1114_v7 = vpop.f32.mrb[18].mxu0  ;;  %1523 = vmax.xlane.f32.xlu0 %v1522_v5  ;;  %1520 = vmax.xlane.f32.xlu1 %v1519_v6  ;;  %v1066_v8 = vpop.f32.mrb[14].mxu1 }
 0x2e1   : > { %v3406_v9 = vpop.f32.mrb[15].mxu1  ;;  %v3412_v10 = vpop.f32.mrb[19].mxu0 }
 0x2e2   : > { %v4338_v8 = vpop.permute.xlu1 %1790 }
 0x2e6   : > { %v4303_v12 = vpop.f32.mrb[16].mxu1  ;;  %v4305_v13 = vpop.f32.mrb[20].mxu0 }
 0x2e7   : > { %v3417_v14 = vpop.f32.mrb[17].mxu1  ;;  %v3423_v15 = vpop.f32.mrb[21].mxu0  ;;  %v1528_v16 = vsel %vm734_vm3, %v4305_v13, -inf  ;;  %v1525_v17 = vsel %vm734_vm3, %v4303_v12, -inf }
 0x2e8   : > { %v1210_v18 = vpop.f32.mrb[22].mxu0  ;;  %1529 = vmax.xlane.f32.xlu0 %v1528_v16  ;;  %1526 = vmax.xlane.f32.xlu1 %v1525_v17  ;;  %v1162_v19 = vpop.f32.mrb[18].mxu1 }
 0x2e9   : > { %v3418_v20 = vpop.f32.mrb[19].mxu1  ;;  %v3424_v21 = vpop.f32.mrb[23].mxu0 }
 0x2ee   : > { %v4313_v23 = vpop.f32.mrb[20].mxu1  ;;  %v4315_v24 = vpop.f32.mrb[24].mxu0 }
 0x2ef   : > { %v3429_v25 = vpop.f32.mrb[21].mxu1  ;;  %v3435_v26 = vpop.f32.mrb[25].mxu0  ;;  %v1534_v29 = vsel %vm734_vm3, %v4315_v24, -inf  ;;  %v1531_v30 = vsel %vm734_vm3, %v4313_v23, -inf }
 0x2f0   : > { %v1306_v31 = vpop.f32.mrb[26].mxu0  ;;  %1535 = vmax.xlane.f32.xlu0 %v1534_v29  ;;  %1532 = vmax.xlane.f32.xlu1 %v1531_v30  ;;  %v1258_v33 = vpop.f32.mrb[22].mxu1 }
 0x2f1   : > { %v3430_v34 = vpop.f32.mrb[23].mxu1  ;;  %v3436_v35 = vpop.f32.mrb[27].mxu0 }
 0x2f6   : > { %v4323_v37 = vpop.f32.mrb[24].mxu1  ;;  %v4325_v40 = vpop.f32.mrb[28].mxu0 }
 0x2f7   : > { %v3441_v41 = vpop.f32.mrb[25].mxu1  ;;  %v3447_v42 = vpop.f32.mrb[29].mxu0  ;;  %v1540_v43 = vsel %vm734_vm3, %v4325_v40, -inf  ;;  %v1537_v44 = vsel %vm734_vm3, %v4323_v37, -inf }
 0x2f8   : > { %v1402_v45 = vpop.f32.mrb[30].mxu0  ;;  %1541 = vmax.xlane.f32.xlu0 %v1540_v43  ;;  %1538 = vmax.xlane.f32.xlu1 %v1537_v44  ;;  %v1354_v46 = vpop.f32.mrb[26].mxu1 }
 0x2f9   : > { %v3442_v47 = vpop.f32.mrb[27].mxu1  ;;  %v3448_v53 = vpop.f32.mrb[31].mxu0 }
 0x2fc   : > { %v1503_v54 = vpop.xlane.xlu0 %1502 }
 0x2fd   : > { %v1549_v57 = vsub.f32 %v4269_v27, %v1503_v54  ;;  %v4342_v27 = vpop.permute.xlu1 %1982 }
 0x2fe   : > { %v4332_v58 = vpop.f32.mrb[28].mxu1  ;;  %v4334_v61 = vpop.f32.mrb[32].mxu0 }
 0x2ff   : > { %v1565_v62 = vmul.f32 1.442695, %v1549_v57  ;;  %v3453_v63 = vpop.f32.mrb[29].mxu1  ;;  %v3459_v0 = vpop.f32.mrb[33].mxu0  ;;  %v1546_v4 = vsel %vm734_vm3, %v4334_v61, -inf  ;;  %v1543_v14 = vsel %vm734_vm3, %v4332_v58, -inf }
 0x300   : > { %v1498_v3 = vpop.f32.mrb[34].mxu0  ;;  %v1450_v5 = vpop.f32.mrb[30].mxu1  ;;  %1547 = vmax.xlane.f32.xlu0 %v1546_v4 }
 0x301   : > { %v3454_v6 = vpop.f32.mrb[31].mxu1  ;;  %v3460_v7 = vpop.f32.mrb[35].mxu0  ;;  %3707 = vpow2.f32 %v1565_v62 }
 0x302   : > { %v4348_v15 = vpop.permute.xlu1 %1886 }
 0x304   : > { %v1509_v17 = vpop.xlane.xlu0 %1508 }
 0x305   : > { %v1551_v29 = vsub.f32 %v4277_v38, %v1509_v17 }
 0x306   : > { %v4352_v16 = vpop.permute.xlu1 %2078 }
 0x308   : > { %v1512_v20 = vpop.xlane.xlu0 %1511 }
 0x309   : > { %v1552_v25 = vsub.f32 %v4279_v39, %v1512_v20 }
 0x30a   : > { %v1506_v18 = vpop.xlane.xlu1 %1505 }
 0x30b   : > { %v4340_v9 = vpop.eup %3707  ;;  %v1550_v19 = vsub.f32 %v4271_v28, %v1506_v18  ;;  %v1571_v26 = vmul.f32 1.442695, %v1552_v25 }
 0x30c   : > { %v1597_v10 = vsel %vm734_vm3, %v4340_v9, 0.0 }
 0x30d   : > { %1598 = vadd.xlane.f32.xlu1 %v1597_v10  ;;  %v1567_v21 = vmul.f32 1.442695, %v1550_v19 }
 0x30f   : > { %3709 = vpow2.f32 %v1567_v21 }
 0x310   : > { %3711 = vpow2.f32 %v1571_v26 }
 0x311   : > { %1544 = vmax.xlane.f32.xlu1 %v1543_v14 }
 0x316   : > { %2126 = vrot.lane.b32.xlu0 %v4129_v48, %s3901_s18 }
 0x319   : > { %v4360_v48 = vpop.eup %3709 }
 0x31a   : > { %v1600_v28 = vsel %vm734_vm3, %v4360_v48, 0.0  ;;  %v4365_v30 = vpop.eup %3711 }
 0x31b   : > { %v1606_v39 = vsel %vm734_vm3, %v4365_v30, 0.0 }
 0x322   : > { %2174 = vrot.lane.b32.xlu1 %v4135_v51, %s3901_s18  ;;  %v1569_v51 = vmul.f32 1.442695, %v1551_v29 }
 0x324   : > { %3713 = vpow2.f32 %v1569_v51 }
 0x326   : > { %2222 = vrot.lane.b32.xlu1 %v4137_v52, %s3901_s18 }
 0x32e   : > { %v4369_v52 = vpop.eup %3713 }
 0x32f   : > { %v1603_v31 = vsel %vm734_vm3, %v4369_v52, 0.0 }
 0x335   : > { %1601 = vadd.xlane.f32.xlu0 %v1600_v28 }
 0x339   : > { %1607 = vadd.xlane.f32.xlu0 %v1606_v39 }
 0x34a   : > { %1604 = vadd.xlane.f32.xlu1 %v1603_v31 }
 0x365   : > { %v1515_v33 = vpop.xlane.xlu1 %1514  ;;  %v1518_v38 = vpop.xlane.xlu0 %1517 }
 0x366   : > { %v1553_v34 = vsub.f32 %v4285_v49, %v1515_v33  ;;  %v1554_v35 = vsub.f32 %v4287_v50, %v1518_v38  ;;  %v1796_v38 = vsel %vm1698_vm4, %v4338_v8, 0 }
 0x368   : > { %v1573_v41 = vmul.f32 1.442695, %v1553_v34  ;;  %v1575_v42 = vmul.f32 1.442695, %v1554_v35 }
 0x36a   : > { %3715 = vpow2.f32 %v1573_v41 }
 0x36b   : > { %3717 = vpow2.f32 %v1575_v42 }
 0x36d   : > { %v1521_v43 = vpop.xlane.xlu1 %1520  ;;  %v1524_v44 = vpop.xlane.xlu0 %1523 }
 0x36e   : > { %v1555_v45 = vsub.f32 %v4293_v1, %v1521_v43  ;;  %v1556_v46 = vsub.f32 %v4295_v2, %v1524_v44 }
 0x370   : > { %v1577_v47 = vmul.f32 1.442695, %v1555_v45  ;;  %v1579_v53 = vmul.f32 1.442695, %v1556_v46 }
 0x372   : > { %3719 = vpow2.f32 %v1577_v47 }
 0x373   : > { %3721 = vpow2.f32 %v1579_v53 }
 0x374   : > { %v4377_v54 = vpop.eup %3715 }
 0x375   : > { %v4379_v57 = vpop.eup %3717  ;;  %v1527_v49 = vpop.xlane.xlu1 %1526  ;;  %v1609_v62 = vsel %vm734_vm3, %v4377_v54, 0.0 }
 0x376   : > { %v1530_v50 = vpop.xlane.xlu0 %1529  ;;  %v1557_v63 = vsub.f32 %v4303_v12, %v1527_v49  ;;  %1610 = vadd.xlane.f32.xlu1 %v1609_v62  ;;  %v1612_v1 = vsel %vm734_vm3, %v4379_v57, 0.0 }
 0x377   : > { %v1558_v0 = vsub.f32 %v4305_v13, %v1530_v50  ;;  %1613 = vadd.xlane.f32.xlu0 %v1612_v1 }
 0x378   : > { %v1581_v2 = vmul.f32 1.442695, %v1557_v63 }
 0x379   : > { %v1583_v3 = vmul.f32 1.442695, %v1558_v0 }
 0x37a   : > { %3723 = vpow2.f32 %v1581_v2 }
 0x37b   : > { %3725 = vpow2.f32 %v1583_v3 }
 0x37c   : > { %v4387_v4 = vpop.eup %3719 }
 0x37d   : > { %v4389_v5 = vpop.eup %3721  ;;  %v1533_v6 = vpop.xlane.xlu1 %1532  ;;  %v1615_v12 = vsel %vm734_vm3, %v4387_v4, 0.0 }
 0x37e   : > { %v1536_v7 = vpop.xlane.xlu0 %1535  ;;  %v1559_v13 = vsub.f32 %v4313_v23, %v1533_v6  ;;  %1616 = vadd.xlane.f32.xlu1 %v1615_v12  ;;  %v1618_v14 = vsel %vm734_vm3, %v4389_v5, 0.0 }
 0x37f   : > { %v1560_v10 = vsub.f32 %v4315_v24, %v1536_v7  ;;  %1619 = vadd.xlane.f32.xlu0 %v1618_v14  ;;  %v1844_v7 = vsel %vm1698_vm4, %v4301_v11, 0  ;;  %v1940_v11 = vsel %vm1698_vm4, %v4321_v36, 0 }
 0x380   : > { %v1585_v17 = vmul.f32 1.442695, %v1559_v13 }
 0x381   : > { %v1587_v18 = vmul.f32 1.442695, %v1560_v10 }
 0x382   : > { %3727 = vpow2.f32 %v1585_v17  ;;  %v1892_v17 = vsel %vm1698_vm4, %v4348_v15, 0 }
 0x383   : > { %3729 = vpow2.f32 %v1587_v18 }
 0x384   : > { %v4397_v19 = vpop.eup %3723 }
 0x385   : > { %v4399_v20 = vpop.eup %3725  ;;  %v1621_v21 = vsel %vm734_vm3, %v4397_v19, 0.0  ;;  %v1539_v28 = vpop.xlane.xlu1 %1538 }
 0x386   : > { %1622 = vadd.xlane.f32.xlu1 %v1621_v21  ;;  %v1624_v23 = vsel %vm734_vm3, %v4399_v20, 0.0  ;;  %v1542_v34 = vpop.xlane.xlu0 %1541  ;;  %v1561_v35 = vsub.f32 %v4323_v37, %v1539_v28 }
 0x387   : > { %1625 = vadd.xlane.f32.xlu0 %v1624_v23 }
 0x38c   : > { %v4405_v24 = vpop.eup %3727 }
 0x38d   : > { %v4407_v25 = vpop.eup %3729  ;;  %v1627_v26 = vsel %vm734_vm3, %v4405_v24, 0.0  ;;  %v1548_v41 = vpop.xlane.xlu0 %1547 }
 0x38e   : > { %1628 = vadd.xlane.f32.xlu1 %v1627_v26  ;;  %v1630_v29 = vsel %vm734_vm3, %v4407_v25, 0.0  ;;  %v1564_v8 = vsub.f32 %v4334_v61, %v1548_v41 }
 0x38f   : > { %1631 = vadd.xlane.f32.xlu0 %v1630_v29 }
 0x390   : > { %v1595_v45 = vmul.f32 1.442695, %v1564_v8 }
 0x391   : > { %v4430_v37 = vpop.permute.xlu0 %2126 }
 0x39a   : > { %v1599_v51 = vpop.xlane.xlu1 %1598 }
 0x39b   : > { %3731 = vrcp.f32 %v1599_v51  ;;  %v1988_v51 = vsel %vm1698_vm4, %v4342_v27, 0 }
 0x39f   : > { %2318 = vrot.lane.b32.xlu1 %v4149_v56, %s3901_s18  ;;  %v1545_v56 = vpop.xlane.xlu1 %1544 }
 0x3a0   : > { %v1563_v42 = vsub.f32 %v4332_v58, %v1545_v56  ;;  %v2132_v56 = vsel %vm1698_vm4, %v4430_v37, 0 }
 0x3a2   : > { %v1593_v44 = vmul.f32 1.442695, %v1563_v42 }
 0x3a3   : > { %v4446_v1 = vpop.permute.xlu1 %2174 }
 0x3a4   : > { %v2180_v8 = vsel %vm1698_vm4, %v4446_v1, 0 }
 0x3a5   : > { %2270 = vrot.lane.b32.xlu0 %v4147_v55, %s3901_s18  ;;  %v3732_v39 = vpop.eup %3731  ;;  %v1562_v55 = vsub.f32 %v4325_v40, %v1542_v34 }
 0x3a6   : > { %v1661_v31 = vmul.f32 %v3732_v39, %v4340_v9  ;;  %v1589_v9 = vmul.f32 1.442695, %v1561_v35  ;;  %v2084_v35 = vsel %vm1698_vm4, %v4352_v16, 0 }
 0x3a7   : > { %v1591_v43 = vmul.f32 1.442695, %v1562_v55  ;;  %v4452_v12 = vpop.permute.xlu1 %2222 }
 0x3a8   : > { %v1677_v33 = vpack.c.bf16 %v1661_v31, %v1661_v31  ;;  %3733 = vpow2.f32 %v1589_v9  ;;  %v2036_v31 = vsel %vm1698_vm4, %v4311_v22, 0 }
 0x3a9   : > { %3735 = vpow2.f32 %v1591_v43 }
 0x3aa   : > { %3464 = vmatmul.mubr.msk.bf16.vlgmr.msra.gmra.mrb[32].mxu1 %vm734_vm3, %v1677_v33  ;;  %3737 = vpow2.f32 %v1593_v44  ;;  %v2228_v44 = vsel %vm1698_vm4, %v4452_v12, 0 }
 0x3ab   : > { %3474 = vmatpush3.bf16.msra.mxu1 %v1796_v38  ;;  %3475 = vmatprep.mubr.msk.bf16.mxu1 %vm3898_vm2, %v3895_v32  ;;  %3739 = vpow2.f32 %v1595_v45 }
 0x3ac   : > { %3485 = vmatprep.subr.bf16.mxu1 %v3895_v32 }
 0x3b2   : > { %v4428_v46 = vpop.eup %3733 }
 0x3b3   : > { %v4432_v47 = vpop.eup %3735  ;;  %v1633_v40 = vsel %vm734_vm3, %v4428_v46, 0.0 }
 0x3b4   : > { %v4436_v53 = vpop.eup %3737  ;;  %v1636_v61 = vsel %vm734_vm3, %v4432_v47, 0.0 }
 0x3b5   : > { %v4440_v49 = vpop.eup %3739  ;;  %v1639_v50 = vsel %vm734_vm3, %v4436_v53, 0.0 }
 0x3b6   : > { %v1642_v63 = vsel %vm734_vm3, %v4440_v49, 0.0 }
 0x3c2   : > { %v1602_v58 = vpop.xlane.xlu0 %1601 }
 0x3c3   : > { %1634 = vadd.xlane.f32.xlu1 %v1633_v40  ;;  %3741 = vrcp.f32 %v1602_v58 }
 0x3c4   : > { %1637 = vadd.xlane.f32.xlu0 %v1636_v61 }
 0x3c6   : > { %v1608_v62 = vpop.xlane.xlu0 %1607 }
 0x3c7   : > { %1640 = vadd.xlane.f32.xlu1 %v1639_v50  ;;  %3743 = vrcp.f32 %v1608_v62 }
 0x3c8   : > { %1643 = vadd.xlane.f32.xlu0 %v1642_v63 }
 0x3cd   : > { %v3742_v0 = vpop.eup %3741 }
 0x3ce   : > { %v1662_v2 = vmul.f32 %v3742_v0, %v4360_v48 }
 0x3d0   : > { %v1678_v3 = vpack.c.bf16 %v1662_v2, %v1662_v2 }
 0x3d1   : > { %v3744_v6 = vpop.eup %3743 }
 0x3d2   : > { %3470 = vmatmul.mubr.msk.bf16.vlgmr.msra.gmra.mrb[36].mxu0 %vm734_vm3, %v1678_v3  ;;  %v1664_v13 = vmul.f32 %v3744_v6, %v4365_v30 }
 0x3d3   : > { %3480 = vmatpush3.bf16.msra.mxu0 %v1844_v7  ;;  %3481 = vmatprep.mubr.msk.bf16.mxu0 %vm3898_vm2, %v3895_v32 }
 0x3d4   : > { %3491 = vmatprep.subr.bf16.mxu0 %v3895_v32  ;;  %v1680_v48 = vpack.c.bf16 %v1664_v13, %v1664_v13 }
 0x3d7   : > { %v1605_v10 = vpop.xlane.xlu1 %1604 }
 0x3d8   : > { %2414 = vrot.lane.b32.xlu1 %v4157_v60, %s3901_s18  ;;  %3745 = vrcp.f32 %v1605_v10 }
 0x3da   : > { %3482 = vmatmul.mubr.msk.bf16.vlgmr.msra.gmra.mrb[40].mxu0 %vm734_vm3, %v1680_v48 }
 0x3db   : > { %3492 = vmatpush3.bf16.msra.mxu0 %v1940_v11  ;;  %3493 = vmatprep.mubr.msk.bf16.mxu0 %vm3898_vm2, %v3895_v32 }
 0x3dc   : > { %3503 = vmatprep.subr.bf16.mxu0 %v3895_v32 }
 0x3de   : > { %2366 = vrot.lane.b32.xlu0 %v4155_v59, %s3901_s18  ;;  %s3269_s18 = sshll.u32 %s3877_s24, 5 }
 0x3e2   : > { %v3746_v30 = vpop.eup %3745 }
 0x3e3   : > { %v1663_v14 = vmul.f32 %v3746_v30, %v4369_v52 }
 0x3e5   : > { %v1679_v60 = vpack.c.bf16 %v1663_v14, %v1663_v14 }
 0x3e7   : > { %3476 = vmatmul.mubr.msk.bf16.vlgmr.msra.gmra.mrb[36].mxu1 %vm734_vm3, %v1679_v60 }
 0x3e8   : > { %3486 = vmatpush3.bf16.msra.mxu1 %v1892_v17  ;;  %3487 = vmatprep.mubr.msk.bf16.mxu1 %vm3898_vm2, %v3895_v32 }
 0x3e9   : > { %3497 = vmatprep.subr.bf16.mxu1 %v3895_v32 }
 0x403   : > { %v1611_v36 = vpop.xlane.xlu1 %1610 }
 0x404   : > { %3747 = vrcp.f32 %v1611_v36  ;;  %v1614_v18 = vpop.xlane.xlu0 %1613 }
 0x405   : > { %3749 = vrcp.f32 %v1614_v18 }
 0x40b   : > { %v1617_v59 = vpop.xlane.xlu1 %1616 }
 0x40c   : > { %3751 = vrcp.f32 %v1617_v59  ;;  %v1620_v21 = vpop.xlane.xlu0 %1619 }
 0x40d   : > { %3753 = vrcp.f32 %v1620_v21 }
 0x40e   : > { %v3748_v52 = vpop.eup %3747 }
 0x40f   : > { %v3750_v23 = vpop.eup %3749  ;;  %v1665_v15 = vmul.f32 %v3748_v52, %v4377_v54 }
 0x410   : > { %v1666_v26 = vmul.f32 %v3750_v23, %v4379_v57 }
 0x411   : > { %v1681_v29 = vpack.c.bf16 %v1665_v15, %v1665_v15 }
 0x412   : > { %v1682_v28 = vpack.c.bf16 %v1666_v26, %v1666_v26 }
 0x413   : > { %3488 = vmatmul.mubr.msk.bf16.vlgmr.msra.gmra.mrb[40].mxu1 %vm734_vm3, %v1681_v29  ;;  %v1623_v39 = vpop.xlane.xlu1 %1622 }
 0x414   : > { %3498 = vmatpush3.bf16.msra.mxu1 %v1988_v51  ;;  %3755 = vrcp.f32 %v1623_v39  ;;  %3494 = vmatmul.mubr.msk.bf16.vlgmr.msra.gmra.mrb[44].mxu0 %vm734_vm3, %v1682_v28  ;;  %v1626_v33 = vpop.xlane.xlu0 %1625 }
 0x415   : > { %3504 = vmatpush3.bf16.msra.mxu0 %v2036_v31  ;;  %3757 = vrcp.f32 %v1626_v33  ;;  %3499 = vmatprep.mubr.msk.bf16.mxu1 %vm3898_vm2, %v3895_v32 }
 0x416   : > { %v3752_v54 = vpop.eup %3751  ;;  %3505 = vmatprep.mubr.msk.bf16.mxu0 %vm3898_vm2, %v3895_v32  ;;  %3509 = vmatprep.subr.bf16.mxu1 %v3895_v32 }
 0x417   : > { %v3754_v27 = vpop.eup %3753  ;;  %v1667_v57 = vmul.f32 %v3752_v54, %v4387_v4  ;;  %3515 = vmatprep.subr.bf16.mxu0 %v3895_v32 }
 0x418   : > { %v1668_v22 = vmul.f32 %v3754_v27, %v4389_v5 }
 0x419   : > { %v1683_v38 = vpack.c.bf16 %v1667_v57, %v1667_v57 }
 0x41a   : > { %v1684_v34 = vpack.c.bf16 %v1668_v22, %v1668_v22 }
 0x41b   : > { %3500 = vmatmul.mubr.msk.bf16.vlgmr.msra.gmra.mrb[44].mxu1 %vm734_vm3, %v1683_v38  ;;  %v1629_v55 = vpop.xlane.xlu1 %1628 }
 0x41c   : > { %3510 = vmatpush3.bf16.msra.mxu1 %v2084_v35  ;;  %3759 = vrcp.f32 %v1629_v55  ;;  %3506 = vmatmul.mubr.msk.bf16.vlgmr.msra.gmra.mrb[48].mxu0 %vm734_vm3, %v1684_v34  ;;  %v1632_v4 = vpop.xlane.xlu0 %1631 }
 0x41d   : > { %3516 = vmatpush3.bf16.msra.mxu0 %v2132_v56  ;;  %3761 = vrcp.f32 %v1632_v4  ;;  %3511 = vmatprep.mubr.msk.bf16.mxu1 %vm3898_vm2, %v3895_v32 }
 0x41e   : > { %v3756_v5 = vpop.eup %3755  ;;  %3517 = vmatprep.mubr.msk.bf16.mxu0 %vm3898_vm2, %v3895_v32  ;;  %3521 = vmatprep.subr.bf16.mxu1 %v3895_v32 }
 0x41f   : > { %v3758_v16 = vpop.eup %3757  ;;  %v1669_v41 = vmul.f32 %v3756_v5, %v4397_v19  ;;  %3527 = vmatprep.subr.bf16.mxu0 %v3895_v32  ;;  %v2319_v58 = vpop.permute.xlu1 %2318 }
 0x420   : > { %v1670_v9 = vmul.f32 %v3758_v16, %v4399_v20  ;;  %v2271_v40 = vpop.permute.xlu0 %2270  ;;  %v2324_v63 = vsel %vm1698_vm4, %v2319_v58, 0 }
 0x421   : > { %v1685_v42 = vpack.c.bf16 %v1669_v41, %v1669_v41  ;;  %v2276_v62 = vsel %vm1698_vm4, %v2271_v40, 0 }
 0x422   : > { %v1686_v43 = vpack.c.bf16 %v1670_v9, %v1670_v9 }
 0x423   : > { %3512 = vmatmul.mubr.msk.bf16.vlgmr.msra.gmra.mrb[48].mxu1 %vm734_vm3, %v1685_v42 }
 0x424   : > { %3518 = vmatmul.mubr.msk.bf16.vlgmr.msra.gmra.mrb[52].mxu0 %vm734_vm3, %v1686_v43  ;;  %3522 = vmatpush3.bf16.msra.mxu1 %v2180_v8 }
 0x425   : > { %3528 = vmatpush3.bf16.msra.mxu0 %v2228_v44  ;;  %3523 = vmatprep.mubr.msk.bf16.mxu1 %vm3898_vm2, %v3895_v32 }
 0x426   : > { %v3760_v19 = vpop.eup %3759  ;;  %3529 = vmatprep.mubr.msk.bf16.mxu0 %vm3898_vm2, %v3895_v32  ;;  %3533 = vmatprep.subr.bf16.mxu1 %v3895_v32 }
 0x427   : > { %v3762_v20 = vpop.eup %3761  ;;  %v1671_v45 = vmul.f32 %v3760_v19, %v4405_v24  ;;  %3539 = vmatprep.subr.bf16.mxu0 %v3895_v32 }
 0x428   : > { %v1672_v37 = vmul.f32 %v3762_v20, %v4407_v25 }
 0x429   : > { %v1687_v61 = vpack.c.bf16 %v1671_v45, %v1671_v45 }
 0x42a   : > { %v1688_v50 = vpack.c.bf16 %v1672_v37, %v1672_v37 }
 0x42b   : > { %3524 = vmatmul.mubr.msk.bf16.vlgmr.msra.gmra.mrb[52].mxu1 %vm734_vm3, %v1687_v61 }
 0x42c   : > { %3530 = vmatmul.mubr.msk.bf16.vlgmr.msra.gmra.mrb[56].mxu0 %vm734_vm3, %v1688_v50  ;;  %3534 = vmatpush3.bf16.msra.mxu1 %v2276_v62 }
 0x42d   : > { %3540 = vmatpush3.bf16.msra.mxu0 %v2324_v63  ;;  %3535 = vmatprep.mubr.msk.bf16.mxu1 %vm3898_vm2, %v3895_v32 }
 0x42e   : > { %3541 = vmatprep.mubr.msk.bf16.mxu0 %vm3898_vm2, %v3895_v32  ;;  %3545 = vmatprep.subr.bf16.mxu1 %v3895_v32 }
 0x42f   : > { %3551 = vmatprep.subr.bf16.mxu0 %v3895_v32 }
 0x450   : > { %v1635_v24 = vpop.xlane.xlu1 %1634 }
 0x451   : > { %3763 = vrcp.f32 %v1635_v24  ;;  %v1638_v25 = vpop.xlane.xlu0 %1637 }
 0x452   : > { %3765 = vrcp.f32 %v1638_v25 }
 0x454   : > { %v1641_v0 = vpop.xlane.xlu1 %1640 }
 0x455   : > { %3767 = vrcp.f32 %v1641_v0  ;;  %v1644_v1 = vpop.xlane.xlu0 %1643 }
 0x456   : > { %3769 = vrcp.f32 %v1644_v1 }
 0x458   : > { %v2415_v13 = vpop.permute.xlu1 %2414 }
 0x459   : > { %v2367_v12 = vpop.permute.xlu0 %2366  ;;  %v2420_v60 = vsel %vm1698_vm4, %v2415_v13, 0  ;;  %v3700_v13 = vld [vmem:[%s572_s26 + $0x8] sm:$0xff]  }
 0x45a   : > { %v2372_v14 = vsel %vm1698_vm4, %v2367_v12, 0  ;;  %v3699_v12 = vld [vmem:[%s572_s26] sm:$0xff]   ;;  %s600_s26 = scalar_lea.vmem %s4759_s10, %s3877_s24 }
 0x45b   : > { %v3764_v2 = vpop.eup %3763 }
 0x45c   : > { %v3766_v3 = vpop.eup %3765  ;;  %v1673_v6 = vmul.f32 %v3764_v2, %v4428_v46 }
 0x45d   : > { %v1674_v7 = vmul.f32 %v3766_v3, %v4432_v47 }
 0x45e   : > { %v1689_v10 = vpack.c.bf16 %v1673_v6, %v1673_v6 }
 0x45f   : > { %v3768_v48 = vpop.eup %3767  ;;  %v1690_v11 = vpack.c.bf16 %v1674_v7, %v1674_v7 }
 0x460   : > { %v3770_v30 = vpop.eup %3769  ;;  %3536 = vmatmul.mubr.msk.bf16.vlgmr.msra.gmra.mrb[56].mxu1 %vm734_vm3, %v1689_v10  ;;  %v1675_v17 = vmul.f32 %v3768_v48, %v4436_v53 }
 0x461   : > { %3542 = vmatmul.mubr.msk.bf16.vlgmr.msra.gmra.mrb[60].mxu0 %vm734_vm3, %v1690_v11  ;;  %3546 = vmatpush3.bf16.msra.mxu1 %v2372_v14  ;;  %v1676_v46 = vmul.f32 %v3770_v30, %v4440_v49 }
 0x462   : > { %3552 = vmatpush3.bf16.msra.mxu0 %v2420_v60  ;;  %3547 = vmatprep.mubr.msk.bf16.mxu1 %vm3898_vm2, %v3895_v32  ;;  %v1691_v47 = vpack.c.bf16 %v1675_v17, %v1675_v17 }
 0x463   : > { %3553 = vmatprep.mubr.msk.bf16.mxu0 %vm3898_vm2, %v3895_v32  ;;  %v1692_v36 = vpack.c.bf16 %v1676_v46, %v1676_v46  ;;  %3557 = vmatprep.subr.bf16.mxu1 %v3699_v12 }
 0x468   : > { %3548 = vmatmul.mubr.msk.bf16.vlgmr.msra.gmra.mrb[60].mxu1 %vm734_vm3, %v1691_v47 }
 0x469   : > { %3554 = vmatmul.mubr.msk.bf16.vlgmr.msra.gmra.mrb[64].mxu0 %vm734_vm3, %v1692_v36  ;;  %3558 = vmatpush3.bf16.msra.mxu1 %v3699_v12  ;;  %v3788_v12 = vld [vmem:[%s4070_s17 + $0x8] sm:$0xff] }
 0x46a   : > { %3559 = vmatprep.subr.bf16.mxu1 %v3700_v13 }
 0x46d   : > { %3560 = vmatpush3.bf16.msra.mxu1 %v3700_v13 }
 0x47d   : > { %v4543_v18 = vpop.f32.mrb[32].mxu1 }
 0x47e   : > { %v3465_v59 = vpop.f32.mrb[33].mxu1 }
 0x47f   : > { %v1739_v21 = vpop.f32.mrb[34].mxu1 }
 0x480   : > { %v3466_v53 = vpop.f32.mrb[35].mxu1 }
 0x4a5   : > { %v4545_v52 = vpop.f32.mrb[36].mxu0 }
 0x4a6   : > { %v3471_v23 = vpop.f32.mrb[37].mxu0 }
 0x4a7   : > { %v1787_v15 = vpop.f32.mrb[38].mxu0 }
 0x4a8   : > { %v3472_v26 = vpop.f32.mrb[39].mxu0 }
 0x4ad   : > { %v4547_v49 = vpop.f32.mrb[40].mxu0 }
 0x4ae   : > { %v3483_v29 = vpop.f32.mrb[41].mxu0 }
 0x4af   : > { %v1883_v32 = vpop.f32.mrb[42].mxu0 }
 0x4b0   : > { %v3484_v28 = vpop.f32.mrb[43].mxu0 }
 0x4ba   : > { %v4549_v51 = vpop.f32.mrb[36].mxu1 }
 0x4bb   : > { %v3477_v39 = vpop.f32.mrb[37].mxu1 }
 0x4bc   : > { %v1835_v31 = vpop.f32.mrb[38].mxu1 }
 0x4bd   : > { %v3478_v33 = vpop.f32.mrb[39].mxu1 }
 0x4e6   : > { %v1928_v54 = vpop.f32.mrb[40].mxu1 }
 0x4e7   : > { %v1976_v27 = vpop.f32.mrb[44].mxu0  ;;  %v3489_v57 = vpop.f32.mrb[41].mxu1 }
 0x4e8   : > { %v3667_v22 = vpack.i.bf16 %v1976_v27, %v1928_v54  ;;  %v3495_v38 = vpop.f32.mrb[45].mxu0  ;;  %v1931_v34 = vpop.f32.mrb[42].mxu1 }
 0x4e9   : > { %v1979_v35 = vpop.f32.mrb[46].mxu0  ;;  %v3490_v55 = vpop.f32.mrb[43].mxu1 }
 0x4ea   : > { %3668 = vrot.lane.b32.xlu0 %v3667_v22, %s4775_s19  ;;  %v3496_v56 = vpop.f32.mrb[47].mxu0 }
 0x4ee   : > { %v2024_v4 = vpop.f32.mrb[44].mxu1 }
 0x4ef   : > { %v2072_v5 = vpop.f32.mrb[48].mxu0  ;;  %v3501_v16 = vpop.f32.mrb[45].mxu1 }
 0x4f0   : > { %v3672_v41 = vpack.i.bf16 %v2072_v5, %v2024_v4  ;;  %v3507_v9 = vpop.f32.mrb[49].mxu0  ;;  %v2027_v42 = vpop.f32.mrb[46].mxu1 }
 0x4f1   : > { %v2075_v43 = vpop.f32.mrb[50].mxu0  ;;  %v3502_v8 = vpop.f32.mrb[47].mxu1 }
 0x4f2   : > { %3673 = vrot.lane.b32.xlu1 %v3672_v41, %s4775_s19  ;;  %v3508_v44 = vpop.f32.mrb[51].mxu0  ;;  %s4599_s19 = scalar_lea.vmem %s4757_s8, %s3269_s18 }
 0x4f6   : > { %v2120_v19 = vpop.f32.mrb[48].mxu1 }
 0x4f7   : > { %v2168_v20 = vpop.f32.mrb[52].mxu0  ;;  %v3513_v45 = vpop.f32.mrb[49].mxu1 }
 0x4f8   : > { %v3677_v37 = vpack.i.bf16 %v2168_v20, %v2120_v19  ;;  %v3519_v40 = vpop.f32.mrb[53].mxu0  ;;  %v2123_v58 = vpop.f32.mrb[50].mxu1 }
 0x4f9   : > { %v2171_v61 = vpop.f32.mrb[54].mxu0  ;;  %v3514_v50 = vpop.f32.mrb[51].mxu1 }
 0x4fa   : > { %3678 = vrot.lane.b32.xlu0 %v3677_v37, %s3903_s20  ;;  %v3520_v62 = vpop.f32.mrb[55].mxu0 }
 0x4fe   : > { %v2216_v63 = vpop.f32.mrb[52].mxu1 }
 0x4ff   : > { %v2264_v24 = vpop.f32.mrb[56].mxu0  ;;  %v3525_v25 = vpop.f32.mrb[53].mxu1 }
 0x500   : > { %v3682_v0 = vpack.i.bf16 %v2264_v24, %v2216_v63  ;;  %v3531_v1 = vpop.f32.mrb[57].mxu0  ;;  %v2219_v2 = vpop.f32.mrb[54].mxu1 }
 0x501   : > { %v2267_v3 = vpop.f32.mrb[58].mxu0  ;;  %v3526_v6 = vpop.f32.mrb[55].mxu1  ;;  %v3787_v2 = vld [vmem:[%s4070_s17] sm:$0xff] }
 0x502   : > { %3683 = vrot.lane.b32.xlu1 %v3682_v0, %s3903_s20  ;;  %v3532_v7 = vpop.f32.mrb[59].mxu0  ;;  %s602_s20 = scalar_lea.vmem %s4760_s11, %s3877_s24 }
 0x533   : > { %v2312_v10 = vpop.f32.mrb[56].mxu1 }
 0x534   : > { %v2360_v48 = vpop.f32.mrb[60].mxu0  ;;  %v3537_v11 = vpop.f32.mrb[57].mxu1 }
 0x535   : > { %v3687_v30 = vpack.i.bf16 %v2360_v48, %v2312_v10  ;;  %v3543_v14 = vpop.f32.mrb[61].mxu0  ;;  %v2315_v60 = vpop.f32.mrb[58].mxu1  ;;  %v3789_v10 = vld [vmem:[%s4070_s17 + $0x10] sm:$0xff] }
 0x536   : > { %v2363_v17 = vpop.f32.mrb[62].mxu0  ;;  %v3538_v46 = vpop.f32.mrb[59].mxu1  ;;  %v3790_v14 = vld [vmem:[%s4070_s17 + $0x18] sm:$0xff] }
 0x537   : > { %3688 = vrot.lane.b32.xlu0 %v3687_v30, %s3904_s28  ;;  %v3544_v47 = vpop.f32.mrb[63].mxu0 }
 0x53b   : > { %v2408_v36 = vpop.f32.mrb[60].mxu1 }
 0x53c   : > { %v2456_v59 = vpop.f32.mrb[64].mxu0  ;;  %v3549_v21 = vpop.f32.mrb[61].mxu1 }
 0x53d   : > { %v3692_v53 = vpack.i.bf16 %v2456_v59, %v2408_v36  ;;  %v3555_v23 = vpop.f32.mrb[65].mxu0  ;;  %v2411_v15 = vpop.f32.mrb[62].mxu1 }
 0x53e   : > { %v2459_v26 = vpop.f32.mrb[66].mxu0  ;;  %v3550_v29 = vpop.f32.mrb[63].mxu1 }
 0x53f   : > { %v3556_v32 = vpop.f32.mrb[67].mxu0  ;;  %3693 = vrot.lane.b32.xlu1 %v3692_v53, %s3904_s28  ;;  %s580_s28 = scalar_lea.vmem %s4755_s6, %s4085_s16 }
 0x55c   : > { %v3669_v28 = vpop.permute.xlu0 %3668 }
 0x55d   : > { %v3671_v31 = vunpack.i.h.bf16 %v3669_v28  ;;  %v3670_v33 = vunpack.i.l.bf16 %v3669_v28 }
 0x55f   : > { %v2511_v38 = vsel %vm734_vm3, %v4545_v52, %v3671_v31  ;;  %v2510_v34 = vsel %vm734_vm3, %v4543_v18, %v3670_v33 }
 0x564   : > { %v3674_v57 = vpop.permute.xlu1 %3673 }
 0x565   : > { %v3676_v42 = vunpack.i.h.bf16 %v3674_v57  ;;  %v3675_v43 = vunpack.i.l.bf16 %v3674_v57 }
 0x567   : > { %v2513_v44 = vsel %vm734_vm3, %v4547_v49, %v3676_v42  ;;  %v2512_v19 = vsel %vm734_vm3, %v4549_v51, %v3675_v43  ;;  %v3236_v49 = vld [vmem:[%s577_s29] ss:$0 sm:$0xff]  ;;  %s604_s29 = scalar_lea.vmem %s4761_s12, %s3877_s24 }
 0x56c   : > { %v3679_v39 = vpop.permute.xlu0 %3678 }
 0x56d   : > { %v3681_v54 = vunpack.i.h.bf16 %v3679_v39  ;;  %v3680_v27 = vunpack.i.l.bf16 %v3679_v39 }
 0x56f   : > { %v2515_v56 = vsel %vm2514_vm5, %v2510_v34, %v3680_v27  ;;  %v2516_v4 = vsel %vm2514_vm5, %v2511_v38, %v3681_v54  ;;  %v3701_v34 = vld [vmem:[%s580_s28] sm:$0xff]  }
 0x570   : > { %3565 = vmatprep.subr.bf16.mxu0 %v3701_v34 }
 0x571   : > { %3566 = vmatpush3.bf16.msra.mxu0 %v3701_v34 }
 0x574   : > { %v3684_v5 = vpop.permute.xlu1 %3683 }
 0x575   : > { %v3686_v8 = vunpack.i.h.bf16 %v3684_v5  ;;  %v3685_v52 = vunpack.i.l.bf16 %v3684_v5 }
 0x577   : > { %v2518_v37 = vsel %vm2514_vm5, %v2513_v44, %v3686_v8  ;;  %v2517_v40 = vsel %vm2514_vm5, %v2512_v19, %v3685_v52 }
 0x5a9   : > { %v3689_v22 = vpop.permute.xlu0 %3688 }
 0x5aa   : > { %v3691_v35 = vunpack.i.h.bf16 %v3689_v22  ;;  %v3690_v55 = vunpack.i.l.bf16 %v3689_v22 }
 0x5ac   : > { %v2520_v16 = vsel %vm2519_vm6, %v2515_v56, %v3690_v55  ;;  %v2521_v41 = vsel %vm2519_vm6, %v2516_v4, %v3691_v35  ;;  %v3702_v35 = vld [vmem:[%s580_s28 + $0x8] sm:$0xff]   ;;  %v3703_v55 = vld [vmem:[%s4599_s19] sm:$0xff]   ;;  %s598_s28 = scalar_lea.vmem %s4758_s9, %s3877_s24 }
 0x5ad   : > { %v2524_v9 = vpack.c.bf16 %v2521_v41, %v2520_v16  ;;  %3567 = vmatprep.subr.bf16.mxu0 %v3702_v35  ;;  %v3704_v56 = vld [vmem:[%s4599_s19 + $0x8] sm:$0xff]   ;;  %3573 = vmatprep.subr.bf16.mxu1 %v3703_v55 }
 0x5ae   : > { %3568 = vmatpush3.bf16.msra.mxu0 %v3702_v35 }
 0x5af   : > { %3561 = vmatprep.mubr.msk.bf16.mxu1 %vm628_vm1, %v2524_v9 }
 0x5b1   : > { %v3694_v18 = vpop.permute.xlu1 %3693 }
 0x5b2   : > { %v3696_v20 = vunpack.i.h.bf16 %v3694_v18  ;;  %v3695_v45 = vunpack.i.l.bf16 %v3694_v18 }
 0x5b4   : > { %v2523_v58 = vsel %vm2519_vm6, %v2518_v37, %v3696_v20  ;;  %v2522_v61 = vsel %vm2519_vm6, %v2517_v40, %v3695_v45  ;;  %v3241_v45 = vld [vmem:[%s600_s26] ss:$0 sm:$0xff] }
 0x5b5   : > { %v2525_v50 = vpack.c.bf16 %v2523_v58, %v2522_v61 }
 0x5b7   : > { %3562 = vmatmul.mubr.msk.bf16.vlgmr.msra.gmra.mrb[64].mxu1 %vm628_vm1, %v2525_v50 }
 0x5b8   : > { %3574 = vmatpush3.bf16.msra.mxu1 %v3703_v55 }
 0x5b9   : > { %3575 = vmatprep.subr.bf16.mxu1 %v3704_v56 }
 0x5bc   : > { %3576 = vmatpush3.bf16.msra.mxu1 %v3704_v56 }
 0x68a   : > { %v3563_v51 = vpop.f32.mrb[64].mxu1 }
 0x68b   : > { %v2584_v62 = vpop.f32.mrb[65].mxu1  ;;  %v2593_v63 = vadd.f32 %v3563_v51, %v3236_v49 }
 0x68c   : > { %v2585_v24 = vadd.f32 %v3236_v49, %v2584_v62  ;;  %v3564_v25 = vpop.f32.mrb[66].mxu1 }
 0x68d   : > { %v2587_v0 = vpop.f32.mrb[67].mxu1  ;;  %v2596_v6 = vadd.f32 %v3564_v25, %v3236_v49  ;;  %v2601_v48 = vadd.f32 %v3789_v10, %v2593_v63  ;;  %v3706_v10 = vld [vmem:[%s4599_s19 + $0x18] sm:$0xff]  }
 0x68e   : > { %v2588_v1 = vadd.f32 %v3236_v49, %v2587_v0  ;;  %v2599_v3 = vadd.f32 %v3787_v2, %v2585_v24  ;;  %v3242_v49 = vld [vmem:[%s602_s20] ss:$0 sm:$0xff] }
 0x68f   : > { %v2609_v30 = vsel %vm628_vm1, %v2601_v48, 0.0  ;;  %v2602_v60 = vadd.f32 %v3790_v14, %v2596_v6 }
 0x690   : > { %v2603_v7 = vsel %vm628_vm1, %v2599_v3, 0.0  ;;  %v2600_v13 = vadd.f32 %v3788_v12, %v2588_v1 }
 0x691   : > { %2604 = vadd.xlane.f32.xlu0 %v2603_v7  ;;  %v2612_v17 = vsel %vm628_vm1, %v2602_v60, 0.0 }
 0x692   : > { %v2606_v11 = vsel %vm628_vm1, %v2600_v13, 0.0 }
 0x693   : > { %2607 = vadd.xlane.f32.xlu1 %v2606_v11 }
 0x695   : > { %2610 = vadd.xlane.f32.xlu0 %v2609_v30 }
 0x699   : > { %2613 = vadd.xlane.f32.xlu0 %v2612_v17 }
 0x71e   : > { %v2605_v46 = vpop.xlane.xlu0 %2604 }
 0x71f   : > { %v2616_v47 = vmul.f32 0.03125, %v2605_v46 }
 0x720   : > { %v2608_v36 = vpop.xlane.xlu1 %2607 }
 0x721   : > { %v2620_v59 = vsub.f32 %v2599_v3, %v2616_v47  ;;  %v2617_v21 = vmul.f32 0.03125, %v2608_v36 }
 0x722   : > { %v2611_v53 = vpop.xlane.xlu0 %2610 }
 0x723   : > { %v2621_v23 = vsub.f32 %v2600_v13, %v2617_v21  ;;  %v2618_v15 = vmul.f32 0.03125, %v2611_v53  ;;  %v2624_v26 = vmul.f32 %v2620_v59, %v2620_v59  ;;  %v3705_v13 = vld [vmem:[%s4599_s19 + $0x10] sm:$0xff]   ;;  %s606_s19 = scalar_lea.vmem %s4762_s13, %s3877_s24 }
 0x724   : > { %3577 = vmatprep.subr.bf16.mxu1 %v3705_v13 }
 0x725   : > { %v2622_v29 = vsub.f32 %v2601_v48, %v2618_v15  ;;  %v2628_v32 = vsel %vm628_vm1, %v2624_v26, 0.0  ;;  %v2625_v28 = vmul.f32 %v2621_v23, %v2621_v23  ;;  %3578 = vmatpush3.bf16.msra.mxu1 %v3705_v13  ;;  %v3243_v48 = vld [vmem:[%s585_s21] ss:$0 sm:$0xff] }
 0x726   : > { %2629 = vadd.xlane.f32.xlu1 %v2628_v32  ;;  %v2614_v39 = vpop.xlane.xlu0 %2613  ;;  %3579 = vmatprep.subr.bf16.mxu1 %v3706_v10 }
 0x727   : > { %v2619_v31 = vmul.f32 0.03125, %v2614_v39  ;;  %v2631_v33 = vsel %vm628_vm1, %v2625_v28, 0.0  ;;  %v2626_v54 = vmul.f32 %v2622_v29, %v2622_v29 }
 0x728   : > { %2632 = vadd.xlane.f32.xlu0 %v2631_v33 }
 0x729   : > { %v2623_v27 = vsub.f32 %v2602_v60, %v2619_v31  ;;  %v2634_v57 = vsel %vm628_vm1, %v2626_v54, 0.0  ;;  %3580 = vmatpush3.bf16.msra.mxu1 %v3706_v10 }
 0x72a   : > { %2635 = vadd.xlane.f32.xlu1 %v2634_v57 }
 0x72b   : > { %v2627_v22 = vmul.f32 %v2623_v27, %v2623_v27 }
 0x72d   : > { %v2637_v38 = vsel %vm628_vm1, %v2627_v22, 0.0 }
 0x72e   : > { %2638 = vadd.xlane.f32.xlu0 %v2637_v38 }
 0x7b3   : > { %v2630_v4 = vpop.xlane.xlu1 %2629 }
 0x7b4   : > { %v2640_v5 = vmul.f32 0.03125, %v2630_v4 }
 0x7b5   : > { %v2633_v16 = vpop.xlane.xlu0 %2632 }
 0x7b6   : > { %v2644_v41 = vadd.f32 1e-12, %v2640_v5  ;;  %v2641_v9 = vmul.f32 0.03125, %v2633_v16 }
 0x7b7   : > { %v2636_v42 = vpop.xlane.xlu1 %2635 }
 0x7b8   : > { %3771 = vrsqrt.f32 %v2644_v41  ;;  %v2645_v43 = vadd.f32 1e-12, %v2641_v9  ;;  %v2642_v8 = vmul.f32 0.03125, %v2636_v42 }
 0x7ba   : > { %3773 = vrsqrt.f32 %v2645_v43  ;;  %v2646_v52 = vadd.f32 1e-12, %v2642_v8 }
 0x7bb   : > { %v2639_v18 = vpop.xlane.xlu0 %2638 }
 0x7bc   : > { %3775 = vrsqrt.f32 %v2646_v52  ;;  %v2643_v44 = vmul.f32 0.03125, %v2639_v18 }
 0x7be   : > { %v2647_v19 = vadd.f32 1e-12, %v2643_v44 }
 0x7c0   : > { %3777 = vrsqrt.f32 %v2647_v19 }
 0x7c2   : > { %v3772_v20 = vpop.eup %3771 }
 0x7c3   : > { %v2652_v37 = vmul.f32 %v3772_v20, %v2620_v59 }
 0x7c4   : > { %v3774_v40 = vpop.eup %3773 }
 0x7c5   : > { %v2653_v58 = vmul.f32 %v3774_v40, %v2621_v23  ;;  %v2662_v61 = vmul.f32 %v3241_v45, %v2652_v37 }
 0x7c6   : > { %v3776_v50 = vpop.eup %3775 }
 0x7c7   : > { %v2654_v51 = vmul.f32 %v3776_v50, %v2622_v29  ;;  %v2663_v62 = vmul.f32 %v3241_v45, %v2653_v58  ;;  %v2672_v63 = vadd.f32 %v3242_v49, %v2662_v61  ;;  %v3248_v29 = vld [vmem:[%s598_s28] ss:$0 sm:$0xff] }
 0x7c9   : > { %v2673_v24 = vadd.f32 %v3242_v49, %v2663_v62  ;;  %v2664_v0 = vmul.f32 %v3241_v45, %v2654_v51 }
 0x7ca   : > { %v3778_v25 = vpop.eup %3777 }
 0x7cb   : > { %v2655_v1 = vmul.f32 %v3778_v25, %v2623_v27  ;;  %v2676_v2 = vpack.c.bf16 %v2673_v24, %v2672_v63  ;;  %v2674_v6 = vadd.f32 %v3242_v49, %v2664_v0 }
 0x7cd   : > { %v2665_v3 = vmul.f32 %v3241_v45, %v2655_v1  ;;  %3569 = vmatprep.mubr.msk.bf16.mxu0 %vm628_vm1, %v2676_v2 }
 0x7cf   : > { %v2675_v7 = vadd.f32 %v3242_v49, %v2665_v3 }
 0x7d1   : > { %v2677_v12 = vpack.c.bf16 %v2675_v7, %v2674_v6 }
 0x7d3   : > { %3570 = vmatmul.mubr.msk.bf16.vlgmr.msra.gmra.mrb[68].mxu0 %vm628_vm1, %v2677_v12 }
 0x8a6   : > { %v3571_v11 = vpop.f32.mrb[68].mxu0 }
 0x8a7   : > { %v2745_v30 = vadd.f32 %v3571_v11, %v3243_v48  ;;  %v2736_v14 = vpop.f32.mrb[69].mxu0  ;;  %v3255_v11 = vld [vmem:[%s604_s29] ss:$0 sm:$0xff] }
 0x8a8   : > { %v2737_v60 = vadd.f32 %v3243_v48, %v2736_v14  ;;  %v3572_v17 = vpop.f32.mrb[70].mxu0 }
 0x8a9   : > { %v2748_v46 = vadd.f32 %v3572_v17, %v3243_v48  ;;  %v2739_v47 = vpop.f32.mrb[71].mxu0  ;;  %v2753_v59 = vmax.f32 %v2745_v30, 0.0 }
 0x8aa   : > { %v2740_v36 = vadd.f32 %v3243_v48, %v2739_v47  ;;  %v2751_v53 = vmax.f32 %v2737_v60, 0.0  ;;  %v3256_v60 = vld [vmem:[%s606_s19] ss:$0 sm:$0xff] }
 0x8ab   : > { %v2754_v21 = vmax.f32 %v2748_v46, 0.0 }
 0x8ac   : > { %v2752_v23 = vmax.f32 %v2740_v36, 0.0 }
 0x8ad   : > { %v2756_v15 = vpack.c.bf16 %v2754_v21, %v2753_v59 }
 0x8ae   : > { %v2755_v26 = vpack.c.bf16 %v2752_v23, %v2751_v53 }
 0x8b0   : > { %3581 = vmatprep.mubr.msk.bf16.mxu1 %vm2787_vm7, %v2755_v26 }
 0x8b1   : > { %3582 = vmatmul.mubr.msk.bf16.vlgmr.msra.gmra.mrb[68].mxu1 %vm2787_vm7, %v2756_v15 }
 0x984   : > { %v3583_v32 = vpop.f32.mrb[68].mxu1 }
 0x985   : > { %v2828_v28 = vpop.f32.mrb[69].mxu1  ;;  %v2837_v39 = vadd.f32 %v3583_v32, %v3248_v29 }
 0x986   : > { %v2829_v31 = vadd.f32 %v3248_v29, %v2828_v28  ;;  %v3584_v33 = vpop.f32.mrb[70].mxu1 }
 0x987   : > { %v2831_v54 = vpop.f32.mrb[71].mxu1  ;;  %v2840_v27 = vadd.f32 %v3584_v33, %v3248_v29  ;;  %v2845_v35 = vadd.f32 %v2837_v39, %v2674_v6 }
 0x988   : > { %v2832_v57 = vadd.f32 %v3248_v29, %v2831_v54  ;;  %v2843_v22 = vadd.f32 %v2829_v31, %v2672_v63 }
 0x989   : > { %v2846_v56 = vadd.f32 %v2840_v27, %v2675_v7  ;;  %v2853_v4 = vsel %vm628_vm1, %v2845_v35, 0.0 }
 0x98a   : > { %v2847_v38 = vsel %vm628_vm1, %v2843_v22, 0.0  ;;  %v2844_v34 = vadd.f32 %v2832_v57, %v2673_v24 }
 0x98b   : > { %2848 = vadd.xlane.f32.xlu1 %v2847_v38  ;;  %v2856_v5 = vsel %vm628_vm1, %v2846_v56, 0.0 }
 0x98c   : > { %v2850_v55 = vsel %vm628_vm1, %v2844_v34, 0.0 }
 0x98d   : > { %2851 = vadd.xlane.f32.xlu0 %v2850_v55 }
 0x98f   : > { %2854 = vadd.xlane.f32.xlu1 %v2853_v4 }
 0x991   : > { %2857 = vadd.xlane.f32.xlu0 %v2856_v5 }
 0xa18   : > { %v2849_v16 = vpop.xlane.xlu1 %2848 }
 0xa19   : > { %v2859_v41 = vmul.f32 0.03125, %v2849_v16 }
 0xa1a   : > { %v2852_v9 = vpop.xlane.xlu0 %2851 }
 0xa1b   : > { %v2863_v42 = vsub.f32 %v2843_v22, %v2859_v41  ;;  %v2860_v43 = vmul.f32 0.03125, %v2852_v9 }
 0xa1c   : > { %v2855_v8 = vpop.xlane.xlu1 %2854 }
 0xa1d   : > { %v2864_v52 = vsub.f32 %v2844_v34, %v2860_v43  ;;  %v2861_v18 = vmul.f32 0.03125, %v2855_v8  ;;  %v2867_v44 = vmul.f32 %v2863_v42, %v2863_v42 }
 0xa1e   : > { %v2858_v19 = vpop.xlane.xlu0 %2857 }
 0xa1f   : > { %v2865_v20 = vsub.f32 %v2845_v35, %v2861_v18  ;;  %v2862_v45 = vmul.f32 0.03125, %v2858_v19  ;;  %v2871_v37 = vsel %vm628_vm1, %v2867_v44, 0.0  ;;  %v2868_v40 = vmul.f32 %v2864_v52, %v2864_v52 }
 0xa20   : > { %2872 = vadd.xlane.f32.xlu1 %v2871_v37 }
 0xa21   : > { %v2866_v58 = vsub.f32 %v2846_v56, %v2862_v45  ;;  %v2874_v61 = vsel %vm628_vm1, %v2868_v40, 0.0  ;;  %v2869_v50 = vmul.f32 %v2865_v20, %v2865_v20 }
 0xa22   : > { %2875 = vadd.xlane.f32.xlu0 %v2874_v61 }
 0xa23   : > { %v2877_v49 = vsel %vm628_vm1, %v2869_v50, 0.0  ;;  %v2870_v51 = vmul.f32 %v2866_v58, %v2866_v58 }
 0xa24   : > { %2878 = vadd.xlane.f32.xlu1 %v2877_v49 }
 0xa25   : > { %v2880_v62 = vsel %vm628_vm1, %v2870_v51, 0.0 }
 0xa26   : > { %2881 = vadd.xlane.f32.xlu0 %v2880_v62 }
 0xaad   : > { %v2873_v63 = vpop.xlane.xlu1 %2872 }
 0xaae   : > { %v2883_v24 = vmul.f32 0.03125, %v2873_v63 }
 0xaaf   : > { %v2876_v25 = vpop.xlane.xlu0 %2875 }
 0xab0   : > { %v2887_v0 = vadd.f32 1e-12, %v2883_v24  ;;  %v2884_v1 = vmul.f32 0.03125, %v2876_v25 }
 0xab1   : > { %v2879_v2 = vpop.xlane.xlu1 %2878 }
 0xab2   : > { %3779 = vrsqrt.f32 %v2887_v0  ;;  %v2888_v3 = vadd.f32 1e-12, %v2884_v1  ;;  %v2885_v6 = vmul.f32 0.03125, %v2879_v2 }
 0xab3   : > { %v2882_v7 = vpop.xlane.xlu0 %2881 }
 0xab4   : > { %3781 = vrsqrt.f32 %v2888_v3  ;;  %v2889_v12 = vadd.f32 1e-12, %v2885_v6  ;;  %v2886_v13 = vmul.f32 0.03125, %v2882_v7 }
 0xab6   : > { %3783 = vrsqrt.f32 %v2889_v12  ;;  %v2890_v10 = vadd.f32 1e-12, %v2886_v13 }
 0xab8   : > { %3785 = vrsqrt.f32 %v2890_v10 }
 0xabc   : > { %v3780_v48 = vpop.eup %3779 }
 0xabd   : > { %v2895_v30 = vmul.f32 %v3780_v48, %v2863_v42 }
 0xabe   : > { %v3782_v14 = vpop.eup %3781 }
 0xabf   : > { %v2905_v17 = vmul.f32 %v3255_v11, %v2895_v30  ;;  %v2896_v46 = vmul.f32 %v3782_v14, %v2864_v52 }
 0xac0   : > { %v3784_v47 = vpop.eup %3783 }
 0xac1   : > { %v2915_v36 = vadd.f32 %v3256_v60, %v2905_v17  ;;  %v2906_v59 = vmul.f32 %v3255_v11, %v2896_v46  ;;  %v2897_v21 = vmul.f32 %v3784_v47, %v2865_v20  ;;  %2922 = sbr.rel (%p3257_p0) target bundleno = 2762 (0xaca), region = 92 }
 0xac2   : > { %v3786_v53 = vpop.eup %3785 }
 0xac3   : > { %v2916_v23 = vadd.f32 %v3256_v60, %v2906_v59  ;;  %v2907_v15 = vmul.f32 %v3255_v11, %v2897_v21  ;;  %v2898_v26 = vmul.f32 %v3786_v53, %v2866_v58  ;;  %2923 = vst.msk [vmem:[%s4070_s17] sm:$0xff] (!%p3257_p0), %vm628_vm1, %v2915_v36 }
 0xac5   : > { %v2917_v29 = vadd.f32 %v3256_v60, %v2907_v15  ;;  %v2908_v32 = vmul.f32 %v3255_v11, %v2898_v26  ;;  %2924 = vst.msk [vmem:[%s4070_s17 + $0x8] sm:$0xff] (!%p3257_p0), %vm628_vm1, %v2916_v23 }
 0xac7   : > { %v2918_v28 = vadd.f32 %v3256_v60, %v2908_v32  ;;  %2925 = vst.msk [vmem:[%s4070_s17 + $0x10] sm:$0xff] (!%p3257_p0), %vm628_vm1, %v2917_v29 }
 0xac9   : > { %2926 = vst.msk [vmem:[%s4070_s17 + $0x18] sm:$0xff] %vm628_vm1, %v2918_v28 }
 0xaca PF: > { %p3258_p1 = scmp.ne.s32.totalorder %s3877_s24, 1 }
 0xacb   : > { %v2937_v39 = vsel (!%p3258_p1), %vm628_vm1, %v2917_v29, 0.0  ;;  %v2931_v31 = vsel (!%p3258_p1), %vm628_vm1, %v2915_v36, 0.0  ;;  %v2940_v33 = vsel (!%p3258_p1), %vm628_vm1, %v2918_v28, 0.0  ;;  %v2934_v54 = vsel (!%p3258_p1), %vm628_vm1, %v2916_v23, 0.0  ;;  %s4791_s20 = sld [smem:[#allocation14_spill]] (!%p3258_p1) }
 0xacc   : > { %2930 = sbr.rel (%p3258_p1) target bundleno = 3111 (0xc27), region = 96  ;;  %2938 = vadd.xlane.f32.xlu1 (!%p3258_p1), %v2937_v39  ;;  %2932 = vadd.xlane.f32.xlu0 (!%p3258_p1), %v2931_v31 }
 0xad0   : > { %2941 = vadd.xlane.f32.xlu1 (!%p3258_p1), %v2940_v33  ;;  %2935 = vadd.xlane.f32.xlu0 (!%p3258_p1), %v2934_v54 }
 0xb59   : > { %v2939_v27 = vpop.xlane.xlu1 %2938  ;;  %v2933_v57 = vpop.xlane.xlu0 %2932 }
 0xb5a   : > { %v2955_v22 = vrot.slane %v2939_v27, 4  ;;  %v2943_v38 = vrot.slane %v2933_v57, 4 }
 0xb5c   : > { %v2956_v34 = vadd.f32 %v2955_v22, %v2939_v27  ;;  %v2944_v35 = vadd.f32 %v2943_v38, %v2933_v57 }
 0xb5d   : > { %v2942_v55 = vpop.xlane.xlu1 %2941  ;;  %v2936_v56 = vpop.xlane.xlu0 %2935 }
 0xb5e   : > { %v2957_v4 = vrot.slane %v2956_v34, 2  ;;  %v2945_v5 = vrot.slane %v2944_v35, 2  ;;  %v2961_v16 = vrot.slane %v2942_v55, 4  ;;  %v2949_v41 = vrot.slane %v2936_v56, 4 }
 0xb60   : > { %v2958_v9 = vadd.f32 %v2957_v4, %v2956_v34  ;;  %v2946_v42 = vadd.f32 %v2945_v5, %v2944_v35  ;;  %v2962_v43 = vadd.f32 %v2961_v16, %v2942_v55  ;;  %v2950_v8 = vadd.f32 %v2949_v41, %v2936_v56 }
 0xb62   : > { %v2959_v52 = vrot.slane %v2958_v9, 1  ;;  %v2947_v18 = vrot.slane %v2946_v42, 1  ;;  %v2963_v44 = vrot.slane %v2962_v43, 2  ;;  %v2951_v19 = vrot.slane %v2950_v8, 2 }
 0xb64   : > { %v2964_v20 = vadd.f32 %v2963_v44, %v2962_v43  ;;  %v2952_v45 = vadd.f32 %v2951_v19, %v2950_v8  ;;  %v2948_v37 = vadd.f32 %v2947_v18, %v2946_v42  ;;  %v2960_v40 = vadd.f32 %v2959_v52, %v2958_v9  ;;  %v3259_v18 = vld [vmem:[%s4763_s14] ss:$0 sm:$0xff] }
 0xb65   : > { %v3260_v19 = vld [vmem:[%s4791_s20] ss:$0 sm:$0xff] }
 0xb66   : > { %v2965_v58 = vrot.slane %v2964_v20, 1  ;;  %v2953_v61 = vrot.slane %v2952_v45, 1  ;;  %v2967_v50 = vmul.f32 0.00390625, %v2948_v37  ;;  %v2969_v49 = vmul.f32 0.00390625, %v2960_v40  ;;  %v3053_v37 = vld [vmem:[%s4068_s15] sm:$0xff] }
 0xb68   : > { %v2971_v51 = vsub.f32 %v2915_v36, %v2967_v50  ;;  %v4653_v62 = vsub.f32 %v2917_v29, %v2969_v49  ;;  %v2954_v63 = vadd.f32 %v2953_v61, %v2952_v45  ;;  %v2966_v24 = vadd.f32 %v2965_v58, %v2964_v20 }
 0xb6a   : > { %v2975_v25 = vmul.f32 %v2971_v51, %v2971_v51  ;;  %v2968_v0 = vmul.f32 0.00390625, %v2954_v63  ;;  %v2970_v1 = vmul.f32 0.00390625, %v2966_v24  ;;  %v2977_v3 = vmul.f32 %v4653_v62, %v4653_v62 }
 0xb6c   : > { %v2979_v2 = vsel %vm628_vm1, %v2975_v25, 0.0  ;;  %v2972_v6 = vsub.f32 %v2916_v23, %v2968_v0  ;;  %v4658_v7 = vsub.f32 %v2918_v28, %v2970_v1  ;;  %v2985_v13 = vsel %vm628_vm1, %v2977_v3, 0.0  ;;  %v3055_v1 = vld [vmem:[%s4068_s15 + $0x10] sm:$0xff] }
 0xb6d   : > { %2980 = vadd.xlane.f32.xlu0 %v2979_v2 }
 0xb6e   : > { %v2976_v12 = vmul.f32 %v2972_v6, %v2972_v6  ;;  %v2978_v48 = vmul.f32 %v4658_v7, %v4658_v7 }
 0xb70   : > { %v2982_v10 = vsel %vm628_vm1, %v2976_v12, 0.0  ;;  %v2988_v11 = vsel %vm628_vm1, %v2978_v48, 0.0 }
 0xb71   : > { %2986 = vadd.xlane.f32.xlu0 %v2985_v13  ;;  %2983 = vadd.xlane.f32.xlu1 %v2982_v10  ;;  %v3056_v10 = vld [vmem:[%s4068_s15 + $0x18] sm:$0xff] }
 0xb75   : > { %2989 = vadd.xlane.f32.xlu1 %v2988_v11 }
 0xbfa   : > { %v2981_v30 = vpop.xlane.xlu0 %2980 }
 0xbfb   : > { %v2991_v14 = vrot.slane %v2981_v30, 4 }
 0xbfd   : > { %v2992_v60 = vadd.f32 %v2991_v14, %v2981_v30 }
 0xbfe   : > { %v2984_v17 = vpop.xlane.xlu1 %2983  ;;  %v2987_v46 = vpop.xlane.xlu0 %2986 }
 0xbff   : > { %v2993_v47 = vrot.slane %v2992_v60, 2  ;;  %v2997_v36 = vrot.slane %v2984_v17, 4  ;;  %v3003_v59 = vrot.slane %v2987_v46, 4 }
 0xc01   : > { %v2994_v21 = vadd.f32 %v2993_v47, %v2992_v60  ;;  %v2998_v53 = vadd.f32 %v2997_v36, %v2984_v17  ;;  %v3004_v23 = vadd.f32 %v3003_v59, %v2987_v46 }
 0xc02   : > { %v2990_v15 = vpop.xlane.xlu1 %2989 }
 0xc03   : > { %v2995_v26 = vrot.slane %v2994_v21, 1  ;;  %v2999_v29 = vrot.slane %v2998_v53, 2  ;;  %v3005_v32 = vrot.slane %v3004_v23, 2  ;;  %v3009_v28 = vrot.slane %v2990_v15, 4 }
 0xc05   : > { %v2996_v39 = vadd.f32 %v2995_v26, %v2994_v21  ;;  %v3000_v31 = vadd.f32 %v2999_v29, %v2998_v53  ;;  %v3006_v33 = vadd.f32 %v3005_v32, %v3004_v23  ;;  %v3010_v54 = vadd.f32 %v3009_v28, %v2990_v15 }
 0xc07   : > { %v3015_v27 = vmul.f32 0.00390625, %v2996_v39  ;;  %v3001_v57 = vrot.slane %v3000_v31, 1  ;;  %v3007_v22 = vrot.slane %v3006_v33, 1  ;;  %v3011_v38 = vrot.slane %v3010_v54, 2 }
 0xc09   : > { %v3019_v34 = vadd.f32 1e-12, %v3015_v27  ;;  %v3002_v35 = vadd.f32 %v3001_v57, %v3000_v31  ;;  %v3008_v55 = vadd.f32 %v3007_v22, %v3006_v33  ;;  %v3012_v56 = vadd.f32 %v3011_v38, %v3010_v54 }
 0xc0b   : > { %3791 = vrsqrt.f32 %v3019_v34  ;;  %v3016_v4 = vmul.f32 0.00390625, %v3002_v35  ;;  %v3017_v5 = vmul.f32 0.00390625, %v3008_v55  ;;  %v3013_v16 = vrot.slane %v3012_v56, 1 }
 0xc0d   : > { %v3020_v41 = vadd.f32 1e-12, %v3016_v4  ;;  %v3021_v9 = vadd.f32 1e-12, %v3017_v5  ;;  %v3014_v42 = vadd.f32 %v3013_v16, %v3012_v56 }
 0xc0f   : > { %3793 = vrsqrt.f32 %v3020_v41  ;;  %v3018_v43 = vmul.f32 0.00390625, %v3014_v42 }
 0xc10   : > { %3795 = vrsqrt.f32 %v3021_v9 }
 0xc11   : > { %v3022_v8 = vadd.f32 1e-12, %v3018_v43 }
 0xc13   : > { %3797 = vrsqrt.f32 %v3022_v8 }
 0xc15   : > { %v3792_v52 = vpop.eup %3791 }
 0xc16   : > { %v3027_v44 = vmul.f32 %v3792_v52, %v2971_v51  ;;  %v3054_v51 = vld [vmem:[%s4068_s15 + $0x8] sm:$0xff] }
 0xc18   : > { %v3038_v20 = vmul.f32 %v3259_v18, %v3027_v44 }
 0xc19   : > { %v3794_v45 = vpop.eup %3793 }
 0xc1a   : > { %v3796_v40 = vpop.eup %3795  ;;  %v3049_v58 = vadd.f32 %v3260_v19, %v3038_v20  ;;  %v3028_v61 = vmul.f32 %v3794_v45, %v2972_v6 }
 0xc1b   : > { %v3029_v50 = vmul.f32 %v3796_v40, %v4653_v62 }
 0xc1c   : > { %v3057_v49 = vadd.f32 %v3053_v37, %v3049_v58  ;;  %v3039_v63 = vmul.f32 %v3259_v18, %v3028_v61 }
 0xc1d   : > { %v3798_v24 = vpop.eup %3797  ;;  %v3040_v25 = vmul.f32 %v3259_v18, %v3029_v50 }
 0xc1e   : > { %3061 = vst.msk [vmem:[%s4070_s17] sm:$0xff] %vm628_vm1, %v3057_v49  ;;  %v3050_v0 = vadd.f32 %v3260_v19, %v3039_v63  ;;  %v3030_v2 = vmul.f32 %v3798_v24, %v4658_v7 }
 0xc1f   : > { %v3051_v3 = vadd.f32 %v3260_v19, %v3040_v25 }
 0xc20   : > { %v3058_v12 = vadd.f32 %v3054_v51, %v3050_v0  ;;  %v3041_v13 = vmul.f32 %v3259_v18, %v3030_v2 }
 0xc21   : > { %v3059_v6 = vadd.f32 %v3055_v1, %v3051_v3 }
 0xc22   : > { %3062 = vst.msk [vmem:[%s4070_s17 + $0x8] sm:$0xff] %vm628_vm1, %v3058_v12  ;;  %v3052_v62 = vadd.f32 %v3260_v19, %v3041_v13 }
 0xc23   : > { %3063 = vst.msk [vmem:[%s4070_s17 + $0x10] sm:$0xff] %vm628_vm1, %v3059_v6 }
 0xc24   : > { %v3060_v48 = vadd.f32 %v3056_v10, %v3052_v62 }
 0xc26   : > { %3064 = vst.msk [vmem:[%s4070_s17 + $0x18] sm:$0xff] %vm628_vm1, %v3060_v48 }
 0xc27 PF: > { %s3274_s16 = sshll.u32 %s3881_s25, 9  ;;  %s4793_s24 = sld [smem:[#allocation15_spill]] }
 0xc28   : > { %s3079_s15 = sshll.u32 %s4070_s17, 4  ;;  %s4696_s28 = scalar_lea.sflag [#allocation3], %s525_s30  ;;  %s4692_s15 = int_to_ptr.vmem [resolvable:$true] %s3079_s15 }
 0xc29   : > { %s3799_s20 = scalar_lea.vmem %s4692_s15, 512  ;;  %s3905_s25 = smov [#allocation2]  }
 0xc2a   : > { %p3800_p2 = scmp.ne.s32.totalorder %s4692_s15, %s3799_s20  ;;  %s3803_s1 = sshll.u32 %s3905_s25, 4  ;;  %s3804_s1 = int_to_ptr.vmem [resolvable:$false] %s3803_s1 }
 0xc2b   : > { %s3805_s21 = scalar_lea.vmem %s3804_s1, 1024  ;;  %p3806_p6 = scmp.lt.s32.totalorder %s4692_s15, %s3804_s1 }
 0xc2c   : > { %p3801_p4 = pnand %p3800_p2, %p4041_p3  ;;  %p3807_p7 = scmp.lt.s32.totalorder %s3805_s21, %s3799_s20 }
 0xc2d   : > { %s4794_s18 = smov %s4793_s24  ;;  %s4689_s26 = scalar_lea.hbm %s4793_s24, %s3274_s16 }
 0xc2e   : > { %p3802_p5 = pneg %p3801_p4  ;;  %p3808_p8 = por %p3807_p7, %p3806_p6 }
 0xc30   : > { %p3809_p10 = pnand %p3808_p8, %p3802_p5 }
 0xc32   : > { %3812 = shalt.err (!%p3809_p10)
}
 0xc33   : > { %s3813_s17 = scalar_lea.hbm %s4689_s26, 512  ;;  %s3817_s19 = scalar_lea.hbm %s4794_s18, 1024 }
 0xc34   : > { %p3814_p11 = scmp.ne.s32.totalorder %s4689_s26, %s3813_s17  ;;  %p3818_p0 = scmp.lt.u32.totalorder %s4689_s26, %s4794_s18 }
 0xc35   : > { %p3819_p1 = scmp.lt.u32.totalorder %s3817_s19, %s3813_s17  ;;  %p3821_p4 = scmp.lt.u32.totalorder %s3813_s17, %s4689_s26 }
 0xc36   : > { %p3815_p12 = pnand %p3814_p11, %p4041_p3 }
 0xc37   : > { %p3820_p2 = por %p3819_p1, %p3818_p0 }
 0xc38   : > { %p3816_p13 = pneg %p3815_p12 }
 0xc39   : > { %p3822_p5 = por %p3821_p4, %p3820_p2 }
 0xc3b   : > { %p3823_p6 = pnand %p3822_p5, %p3816_p13 }
 0xc3d   : > { %3826 = shalt.err (!%p3823_p6)
}
 0xc3e   : > { %s3906_s20 = smov 128   ;;  %s4795_s25 = smov 8  }
 0xc3f   : > { %3585 = dma.vmem_to_hbm [thread:$0]  (%p4041_p3), %s4692_s15, 512, %s4689_s26, %s4696_s28, %s3906_s20, %s3906_s20, %s4795_s25  }
 0xc40 PF: > { %s4796_s21 = sld [smem:[#allocation7_spill]]  ;;  %s4797_s30 = sld [smem:[#allocation5_spill]] }
 0xc46   : > { %p3591_p7 = scmp.ge.s32.totalorder %s4796_s21, 2  ;;  %s3094_s24 = sand.u32 1, %s4797_s30  }
 0xc47   : > { %s3095_s17 = scalar_lea.sflag [#allocation3], %s3094_s24 }
 0xc48   : > { %p3588_p8 = pnand %p3591_p7, %p4051_p9 }
 0xc4a   : > { %3860 = dma.done.wait (!%p3588_p8), %s3095_s17, 512  }
 0xc4b   : > { %3862 = vsyncadd (!%p3588_p8), %s3095_s17, 4294966784  ;;  %s29_s28 = sadd.s32 1, %s4796_s21   ;;  %s4799_s24 = sld [smem:[#allocation6_spill]] }
 0xc4c   : > { %p26_p10 = scmp.ge.s32.totalorder %s29_s28, 6   ;;  %s4800_s26 = sld [smem:[#allocation8_spill]] }
 0xc4d   : > { %s4801_s29 = sld [smem:[#allocation10_spill]]  ;;  %s4802_s21 = smov %s3869_s22 }
 0xc4e   : > { %s4803_s22 = smov %s3873_s23  ;;  %s4804_s23 = smov %s4059_s0 }
 0xc4f   : > { %s4805_s25 = smov %s3889_s27  ;;  %28 = sbr.rel (!%p26_p10) target bundleno = 10 (0xa), region = 143 }
 0xc53   : > { %s4806_s27 = smov %s4801_s29 }
 0xc56   :  { %3100 = vsyncpa [#allocation3], 1 }
 0xc57   :  { %3102 = vsyncpa [#allocation3 + $0x1], 1 }

</bundles_post_ra>
